<compile_context>
chip_gen: v6e
topology: v6e:2x2x1
jax: 0.10.0
libtpu: 0.0.40
codegen_flags: <defaults>
</compile_context>

<pallas_src>
import jax
import jax.numpy as jnp
from jax import lax
from jax.experimental import pallas as pl
from jax.experimental.pallas import tpu as pltpu

VMEM_SPEC = pl.BlockSpec(memory_space=pltpu.MemorySpace.VMEM)


# ----------------------------------------------------------------------------
# In-kernel helpers (operate on values, not refs)
# ----------------------------------------------------------------------------
def _conv_bn_relu_pool(x, w, b):
    """Conv1d(k=3, pad=1) with BN pre-folded into (w, b) + ReLU + MaxPool1d(2).

    x: (T, B, C) time-major; w: (3*C, Cout); b: (1, Cout).  Returns (T//2, B, Cout).
    Implemented as one im2col contraction (single MXU push instead of three).
    """
    T, B, C = x.shape
    Cout = w.shape[-1]
    zero = jnp.zeros((1, B, C), x.dtype)
    x_prev = jnp.concatenate([zero, x[:-1]], axis=0)       # x[t-1], zero padded
    x_next = jnp.concatenate([x[1:], zero], axis=0)        # x[t+1], zero padded
    x3 = jnp.concatenate([x_prev, x, x_next], axis=-1)     # (T, B, 3C)
    y = jnp.einsum('tbc,cd->tbd', x3, w,
                   preferred_element_type=jnp.float32) + b  # (T, B, Cout)
    y = jnp.maximum(y, 0.0)                                  # ReLU
    return jnp.max(y.reshape(T // 2, 2, B, Cout), axis=1)    # MaxPool1d(2)


# ----------------------------------------------------------------------------
# Single fused kernel: conv blocks + BiLSTM + attention pool + classifier
# ----------------------------------------------------------------------------
def _brainwavenet_kernel(x_ref, w1_ref, b1_ref, w2_ref, b2_ref,
                         wih_ref, whh_ref, bl_ref, wa_ref, ctx_ref,
                         wfc_ref, bfc_ref, o_ref):
    x = x_ref[...]                                   # (T, B, Cin)
    B = x.shape[1]
    H2 = whh_ref.shape[0]                            # 2*H (both directions)
    G8 = whh_ref.shape[1]                            # 8*H fused gate width
    H = H2 // 2

    # ---- conv blocks (BN folded, one GEMM each) --------------------------
    y = _conv_bn_relu_pool(x, w1_ref[...], b1_ref[...])     # (T/2, B, F1)
    y = _conv_bn_relu_pool(y, w2_ref[...], b2_ref[...])     # (T/4, B, F2)
    Tl = y.shape[0]

    # ---- BiLSTM: hoisted lane-dense input projection (one GEMM, N=8H) ----
    xproj = (jnp.einsum('tbc,cd->tbd', y, wih_ref[...],
                        preferred_element_type=jnp.float32)
             + bl_ref[...])                                  # (Tl, B, 8H)

    # Gate columns are gate-major with fwd/bwd interleaved:
    #   [i_f, i_b, f_f, f_b, g_f, g_b, o_f, o_b], each block H wide.
    col = lax.broadcasted_iota(jnp.int32, (1, G8), 1)
    fwd_cols = (col % H2) < H                                # forward lanes
    out_cols = lax.broadcasted_iota(jnp.int32, (1, H2), 1) < H

    whh = whh_ref[...]                                       # (2H, 8H) block-diag
    h = jnp.zeros((B, H2), jnp.float32)                      # [h_f | h_b]
    c = jnp.zeros((B, H2), jnp.float32)
    hs = []
    # Fully unrolled recurrence (Tl is small and static): at step s the forward
    # cell consumes time s and the backward cell time Tl-1-s; both directions
    # share one (B,2H)x(2H,8H) MXU push per step.
    for s in range(Tl):
        tb = Tl - 1 - s
        gin = jnp.where(fwd_cols, xproj[s], xproj[tb])       # (B, 8H)
        gates = gin + jnp.dot(h, whh, preferred_element_type=jnp.float32)
        i = jax.nn.sigmoid(gates[:, 0 * H2:1 * H2])
        f = jax.nn.sigmoid(gates[:, 1 * H2:2 * H2])
        g = jnp.tanh(gates[:, 2 * H2:3 * H2])
        o = jax.nn.sigmoid(gates[:, 3 * H2:4 * H2])
        c = f * c + i * g
        h = o * jnp.tanh(c)
        hs.append(h)                                         # [h_f(s) | h_b(tb)]

    # Time-aligned bidirectional output, assembled with lane selects (no concat).
    lstm_out = jnp.stack(
        [jnp.where(out_cols, hs[t], hs[Tl - 1 - t]) for t in range(Tl)],
        axis=0)                                              # (Tl, B, 2H)

    # ---- additive attention pooling over time + classifier head ----------
    sc = jnp.tanh(jnp.einsum('tbd,de->tbe', lstm_out, wa_ref[...],
                             preferred_element_type=jnp.float32))
    s = jnp.sum(sc * ctx_ref[...], axis=-1, keepdims=True)   # (Tl, B, 1) VPU reduce
    m = jnp.max(s, axis=0, keepdims=True)
    e = jnp.exp(s - m)
    w = e / jnp.sum(e, axis=0, keepdims=True)                # softmax over time
    pooled = jnp.sum(w * lstm_out, axis=0)                   # (B, 2H)
    o_ref[...] = (jnp.dot(pooled, wfc_ref[...],
                          preferred_element_type=jnp.float32) + bfc_ref[...])


# ----------------------------------------------------------------------------
# Wrapper-side parameter folding / packing (tiny, one-time per call)
# ----------------------------------------------------------------------------
def _fold_conv_bn(w, b, gamma, beta, mean, var, eps=1e-5):
    """Fold eval-mode BatchNorm1d into the conv weight/bias.

    w: (3, Cin, Cout) -> (3*Cin, Cout);  b/gamma/beta/mean/var: (1, Cout)."""
    k, cin, cout = w.shape
    scale = gamma * lax.rsqrt(var + eps)                     # (1, Cout)
    return w.reshape(k * cin, cout) * scale, (b - mean) * scale + beta


def _pack_bilstm(wih_f, whh_f, b_f, wih_b, whh_b, b_b):
    """Pack fwd/bwd LSTM params into one lane-dense, gate-interleaved layout.

    Column layout of the 8H gate axis: [i_f,i_b,f_f,f_b,g_f,g_b,o_f,o_b]."""
    F2, G4 = wih_f.shape
    H = G4 // 4
    wih = jnp.concatenate([wih_f.reshape(F2, 4, H),
                           wih_b.reshape(F2, 4, H)], axis=-1).reshape(F2, 8 * H)
    z = jnp.zeros((H, 4, H), jnp.float32)
    top = jnp.concatenate([whh_f.reshape(H, 4, H), z], axis=-1).reshape(H, 8 * H)
    bot = jnp.concatenate([z, whh_b.reshape(H, 4, H)], axis=-1).reshape(H, 8 * H)
    whh = jnp.concatenate([top, bot], axis=0)                # block-diag (2H, 8H)
    bl = jnp.concatenate([b_f.reshape(1, 4, H),
                          b_b.reshape(1, 4, H)], axis=-1).reshape(1, 8 * H)
    return wih, whh, bl


# ----------------------------------------------------------------------------
# Parameters (deterministic, shapes match the PyTorch module)
# ----------------------------------------------------------------------------
def init_params(key, input_channels=1, num_filters=8, lstm_hidden=16,
                num_classes=10):
    F1 = num_filters
    F2 = num_filters * 2
    H = lstm_hidden
    H2 = 2 * H
    ks = jax.random.split(key, 12)

    def kaiming(k, shape, fan_in):
        return jax.random.normal(k, shape, jnp.float32) * jnp.sqrt(2.0 / fan_in)

    u = 1.0 / jnp.sqrt(jnp.float32(H))

    def uni(k, shape):
        return jax.random.uniform(k, shape, jnp.float32, -u, u)

    p = {}
    # conv block 1 (weight stored as (k, Cin, Cout), k index 0 -> tap x[t-1])
    p['conv1_w'] = kaiming(ks[0], (3, input_channels, F1), 3 * input_channels)
    p['conv1_b'] = jnp.zeros((1, F1), jnp.float32)
    p['bn1_gamma'] = jnp.ones((1, F1), jnp.float32)
    p['bn1_beta'] = jnp.zeros((1, F1), jnp.float32)
    p['bn1_mean'] = jnp.zeros((1, F1), jnp.float32)
    p['bn1_var'] = jnp.ones((1, F1), jnp.float32)
    # conv block 2
    p['conv2_w'] = kaiming(ks[1], (3, F1, F2), 3 * F1)
    p['conv2_b'] = jnp.zeros((1, F2), jnp.float32)
    p['bn2_gamma'] = jnp.ones((1, F2), jnp.float32)
    p['bn2_beta'] = jnp.zeros((1, F2), jnp.float32)
    p['bn2_mean'] = jnp.zeros((1, F2), jnp.float32)
    p['bn2_var'] = jnp.ones((1, F2), jnp.float32)
    # BiLSTM (weights stored transposed: (in, 4H) / (H, 4H); bias = b_ih + b_hh;
    # gate column order i, f, g, o — matches PyTorch)
    p['lstm_wih_f'] = uni(ks[2], (F2, 4 * H))
    p['lstm_whh_f'] = uni(ks[3], (H, 4 * H))
    p['lstm_b_f'] = uni(ks[4], (1, 4 * H)) * 2.0
    p['lstm_wih_b'] = uni(ks[5], (F2, 4 * H))
    p['lstm_whh_b'] = uni(ks[6], (H, 4 * H))
    p['lstm_b_b'] = uni(ks[7], (1, 4 * H)) * 2.0
    # attention pooling (context vector stored broadcast-ready as (1, 1, H2))
    p['attn_w'] = kaiming(ks[8], (H2, H2), H2)
    p['attn_ctx'] = jax.random.normal(ks[9], (1, 1, H2), jnp.float32)
    # final classifier (Dropout is identity at inference)
    p['fc_w'] = kaiming(ks[10], (H2, num_classes), H2)
    p['fc_b'] = jnp.zeros((1, num_classes), jnp.float32)
    return p


# ----------------------------------------------------------------------------
# Full forward pass: one fused Pallas kernel, packing glue in plain JAX
# ----------------------------------------------------------------------------
@jax.jit
def brainwavenet_forward(x, params):
    # x: (B, Cin, T)  -- PyTorch NCL convention
    B, _, T = x.shape
    # PyTorch MaxPool1d floors odd lengths; this kernel requires T % 4 == 0.
    assert T % 4 == 0, "time length must be divisible by 4 (two MaxPool1d(2))"
    xt = jnp.transpose(x, (2, 0, 1)).astype(jnp.float32)     # (T, B, Cin)

    w1, b1 = _fold_conv_bn(params['conv1_w'], params['conv1_b'],
                           params['bn1_gamma'], params['bn1_beta'],
                           params['bn1_mean'], params['bn1_var'])
    w2, b2 = _fold_conv_bn(params['conv2_w'], params['conv2_b'],
                           params['bn2_gamma'], params['bn2_beta'],
                           params['bn2_mean'], params['bn2_var'])
    wih, whh, bl = _pack_bilstm(params['lstm_wih_f'], params['lstm_whh_f'],
                                params['lstm_b_f'], params['lstm_wih_b'],
                                params['lstm_whh_b'], params['lstm_b_b'])
    nc = params['fc_w'].shape[-1]

    # TODO(synk): add a grid over B with dimension_semantics=("parallel",) as a
    # v7x megacore scaling hook once batch sizes grow beyond toy shapes.
    return pl.pallas_call(
        _brainwavenet_kernel,
        out_shape=jax.ShapeDtypeStruct((B, nc), jnp.float32),
        in_specs=[VMEM_SPEC] * 12,
        out_specs=VMEM_SPEC,
    )(xt, w1, b1, w2, b2, wih, whh, bl,
      params['attn_w'], params['attn_ctx'], params['fc_w'], params['fc_b'])


if __name__ == "__main__":
    key = jax.random.PRNGKey(0)
    k_x, k_p = jax.random.split(key)
    B, Cin, T = 2, 1, 32
    num_classes = 10
    x = jax.random.normal(k_x, (B, Cin, T), jnp.float32)
    params = init_params(k_p, input_channels=Cin, num_filters=8,
                         lstm_hidden=16, num_classes=num_classes)
    logits = brainwavenet_forward(x, params)
    jax.block_until_ready(logits)
    assert logits.shape == (B, num_classes)
    assert bool(jnp.all(jnp.isfinite(logits)))
    print("KERNEL_OK")
</pallas_src>

<mosaic_0001>
module attributes {stable_mosaic.version = 11 : i64} {
  func.func @_brainwavenet_kernel(%arg0: memref<32x2x1xf32, #tpu.memory_space<vmem>>, %arg1: memref<3x8xf32, #tpu.memory_space<vmem>>, %arg2: memref<1x8xf32, #tpu.memory_space<vmem>>, %arg3: memref<24x16xf32, #tpu.memory_space<vmem>>, %arg4: memref<1x16xf32, #tpu.memory_space<vmem>>, %arg5: memref<16x128xf32, #tpu.memory_space<vmem>>, %arg6: memref<32x128xf32, #tpu.memory_space<vmem>>, %arg7: memref<1x128xf32, #tpu.memory_space<vmem>>, %arg8: memref<32x32xf32, #tpu.memory_space<vmem>>, %arg9: memref<1x1x32xf32, #tpu.memory_space<vmem>>, %arg10: memref<32x10xf32, #tpu.memory_space<vmem>>, %arg11: memref<1x10xf32, #tpu.memory_space<vmem>>, %arg12: memref<2x10xf32, #tpu.memory_space<vmem>>) attributes {dimension_semantics = [], scalar_prefetch = 0 : i64, scratch_operands = 0 : i64, tpu.core_type = #tpu.core_type<tc>} {
    %c0 = arith.constant 0 : index
    %c0_0 = arith.constant 0 : index
    %c0_1 = arith.constant 0 : index
    %0 = vector.load %arg0[%c0, %c0_0, %c0_1] : memref<32x2x1xf32, #tpu.memory_space<vmem>>, vector<32x2x1xf32>
    %c0_2 = arith.constant 0 : index
    %c0_3 = arith.constant 0 : index
    %1 = vector.load %arg1[%c0_2, %c0_3] : memref<3x8xf32, #tpu.memory_space<vmem>>, vector<3x8xf32>
    %c0_4 = arith.constant 0 : index
    %c0_5 = arith.constant 0 : index
    %2 = vector.load %arg2[%c0_4, %c0_5] : memref<1x8xf32, #tpu.memory_space<vmem>>, vector<1x8xf32>
    %cst = arith.constant 0.000000e+00 : f32
    %3 = vector.broadcast %cst : f32 to vector<1x2x1xf32>
    %4 = vector.extract_strided_slice %0 {offsets = [0, 0, 0], sizes = [31, 2, 1], strides = [1, 1, 1]} : vector<32x2x1xf32> to vector<31x2x1xf32>
    %5 = tpu.concatenate %3, %4 in 0 : vector<1x2x1xf32>, vector<31x2x1xf32> -> vector<32x2x1xf32>
    %6 = vector.extract_strided_slice %0 {offsets = [1, 0, 0], sizes = [31, 2, 1], strides = [1, 1, 1]} : vector<32x2x1xf32> to vector<31x2x1xf32>
    %7 = tpu.concatenate %6, %3 in 0 : vector<31x2x1xf32>, vector<1x2x1xf32> -> vector<32x2x1xf32>
    %8 = tpu.concatenate %5, %0, %7 in 2 : vector<32x2x1xf32>, vector<32x2x1xf32>, vector<32x2x1xf32> -> vector<32x2x3xf32>
    "tpu.trace_start"() <{level = 10 : i32, message = "tbc,cd->tbd"}> : () -> ()
    %cst_6 = arith.constant dense<0.000000e+00> : vector<32x2x8xf32>
    %9 = tpu.matmul %8, %1, %cst_6 {dimension_numbers = #tpu.dot_dimension_numbers<[2], [0], [0, 1], [1], [0, 0, 0, 1, 1, 1], [], []>} : vector<32x2x3xf32>, vector<3x8xf32>, vector<32x2x8xf32> -> vector<32x2x8xf32>
    "tpu.trace_stop"() : () -> ()
    %10 = vector.shape_cast %2 : vector<1x8xf32> to vector<1x1x8xf32>
    %11 = vector.broadcast %10 : vector<1x1x8xf32> to vector<32x2x8xf32>
    %12 = arith.addf %9, %11 : vector<32x2x8xf32>
    %cst_7 = arith.constant 0.000000e+00 : f32
    %13 = vector.broadcast %cst_7 : f32 to vector<32x2x8xf32>
    %14 = arith.maximumf %12, %13 : vector<32x2x8xf32>
    %15 = vector.shape_cast %14 : vector<32x2x8xf32> to vector<16x2x2x8xf32>
    %cst_8 = arith.constant dense<0xFF800000> : vector<16x2x8xf32>
    %16 = vector.multi_reduction <maximumf>, %15, %cst_8 [1] : vector<16x2x2x8xf32> to vector<16x2x8xf32>
    %c0_9 = arith.constant 0 : index
    %c0_10 = arith.constant 0 : index
    %17 = vector.load %arg3[%c0_9, %c0_10] : memref<24x16xf32, #tpu.memory_space<vmem>>, vector<24x16xf32>
    %c0_11 = arith.constant 0 : index
    %c0_12 = arith.constant 0 : index
    %18 = vector.load %arg4[%c0_11, %c0_12] : memref<1x16xf32, #tpu.memory_space<vmem>>, vector<1x16xf32>
    %cst_13 = arith.constant 0.000000e+00 : f32
    %19 = vector.broadcast %cst_13 : f32 to vector<1x2x8xf32>
    %20 = vector.extract_strided_slice %16 {offsets = [0, 0, 0], sizes = [15, 2, 8], strides = [1, 1, 1]} : vector<16x2x8xf32> to vector<15x2x8xf32>
    %21 = tpu.concatenate %19, %20 in 0 : vector<1x2x8xf32>, vector<15x2x8xf32> -> vector<16x2x8xf32>
    %22 = vector.extract_strided_slice %16 {offsets = [1, 0, 0], sizes = [15, 2, 8], strides = [1, 1, 1]} : vector<16x2x8xf32> to vector<15x2x8xf32>
    %23 = tpu.concatenate %22, %19 in 0 : vector<15x2x8xf32>, vector<1x2x8xf32> -> vector<16x2x8xf32>
    %24 = tpu.concatenate %21, %16, %23 in 2 : vector<16x2x8xf32>, vector<16x2x8xf32>, vector<16x2x8xf32> -> vector<16x2x24xf32>
    "tpu.trace_start"() <{level = 10 : i32, message = "tbc,cd->tbd"}> : () -> ()
    %cst_14 = arith.constant dense<0.000000e+00> : vector<16x2x16xf32>
    %25 = tpu.matmul %24, %17, %cst_14 {dimension_numbers = #tpu.dot_dimension_numbers<[2], [0], [0, 1], [1], [0, 0, 0, 1, 1, 1], [], []>} : vector<16x2x24xf32>, vector<24x16xf32>, vector<16x2x16xf32> -> vector<16x2x16xf32>
    "tpu.trace_stop"() : () -> ()
    %26 = vector.shape_cast %18 : vector<1x16xf32> to vector<1x1x16xf32>
    %27 = vector.broadcast %26 : vector<1x1x16xf32> to vector<16x2x16xf32>
    %28 = arith.addf %25, %27 : vector<16x2x16xf32>
    %cst_15 = arith.constant 0.000000e+00 : f32
    %29 = vector.broadcast %cst_15 : f32 to vector<16x2x16xf32>
    %30 = arith.maximumf %28, %29 : vector<16x2x16xf32>
    %31 = vector.shape_cast %30 : vector<16x2x16xf32> to vector<8x2x2x16xf32>
    %cst_16 = arith.constant dense<0xFF800000> : vector<8x2x16xf32>
    %32 = vector.multi_reduction <maximumf>, %31, %cst_16 [1] : vector<8x2x2x16xf32> to vector<8x2x16xf32>
    %c0_17 = arith.constant 0 : index
    %c0_18 = arith.constant 0 : index
    %33 = vector.load %arg5[%c0_17, %c0_18] : memref<16x128xf32, #tpu.memory_space<vmem>>, vector<16x128xf32>
    "tpu.trace_start"() <{level = 10 : i32, message = "tbc,cd->tbd"}> : () -> ()
    %cst_19 = arith.constant dense<0.000000e+00> : vector<8x2x128xf32>
    %34 = tpu.matmul %32, %33, %cst_19 {dimension_numbers = #tpu.dot_dimension_numbers<[2], [0], [0, 1], [1], [0, 0, 0, 1, 1, 1], [], []>} : vector<8x2x16xf32>, vector<16x128xf32>, vector<8x2x128xf32> -> vector<8x2x128xf32>
    "tpu.trace_stop"() : () -> ()
    %c0_20 = arith.constant 0 : index
    %c0_21 = arith.constant 0 : index
    %35 = vector.load %arg7[%c0_20, %c0_21] : memref<1x128xf32, #tpu.memory_space<vmem>>, vector<1x128xf32>
    %36 = vector.shape_cast %35 : vector<1x128xf32> to vector<1x1x128xf32>
    %37 = vector.broadcast %36 : vector<1x1x128xf32> to vector<8x2x128xf32>
    %38 = arith.addf %34, %37 : vector<8x2x128xf32>
    %39 = tpu.iota {dimensions = array<i32: 1>} : vector<1x128xi32>
    %c32_i32 = arith.constant 32 : i32
    %c0_i32 = arith.constant 0 : i32
    %40 = arith.cmpi eq, %c32_i32, %c0_i32 : i32
    %c1_i32 = arith.constant 1 : i32
    %41 = arith.select %40, %c1_i32, %c32_i32 : i32
    %42 = vector.broadcast %41 : i32 to vector<1x128xi32>
    %43 = arith.remsi %39, %42 : vector<1x128xi32>
    %c0_i32_22 = arith.constant 0 : i32
    %44 = vector.broadcast %c0_i32_22 : i32 to vector<1x128xi32>
    %45 = arith.cmpi ne, %43, %44 : vector<1x128xi32>
    %c0_i32_23 = arith.constant 0 : i32
    %46 = vector.broadcast %c0_i32_23 : i32 to vector<1x128xi32>
    %47 = arith.cmpi slt, %43, %46 : vector<1x128xi32>
    %c0_i32_24 = arith.constant 0 : i32
    %48 = arith.cmpi slt, %41, %c0_i32_24 : i32
    %49 = vector.broadcast %48 : i1 to vector<1x128xi1>
    %50 = vector.broadcast %49 : vector<1x128xi1> to vector<1x128xi1>
    %51 = arith.xori %47, %50 : vector<1x128xi1>
    %52 = arith.andi %51, %45 : vector<1x128xi1>
    %53 = vector.broadcast %41 : i32 to vector<1x128xi32>
    %54 = arith.addi %43, %53 : vector<1x128xi32>
    %55 = arith.select %52, %54, %43 : vector<1x128xi1>, vector<1x128xi32>
    %c16_i32 = arith.constant 16 : i32
    %56 = vector.broadcast %c16_i32 : i32 to vector<1x128xi32>
    %57 = arith.cmpi slt, %55, %56 : vector<1x128xi32>
    %58 = tpu.iota {dimensions = array<i32: 1>} : vector<1x32xi32>
    %c16_i32_25 = arith.constant 16 : i32
    %59 = vector.broadcast %c16_i32_25 : i32 to vector<1x32xi32>
    %60 = arith.cmpi slt, %58, %59 : vector<1x32xi32>
    %c0_26 = arith.constant 0 : index
    %c0_27 = arith.constant 0 : index
    %61 = vector.load %arg6[%c0_26, %c0_27] : memref<32x128xf32, #tpu.memory_space<vmem>>, vector<32x128xf32>
    %cst_28 = arith.constant 0.000000e+00 : f32
    %62 = vector.broadcast %cst_28 : f32 to vector<2x32xf32>
    %cst_29 = arith.constant 0.000000e+00 : f32
    %63 = vector.broadcast %cst_29 : f32 to vector<2x32xf32>
    %64 = vector.extract_strided_slice %38 {offsets = [0, 0, 0], sizes = [1, 2, 128], strides = [1, 1, 1]} : vector<8x2x128xf32> to vector<1x2x128xf32>
    %65 = vector.shape_cast %64 : vector<1x2x128xf32> to vector<2x128xf32>
    %66 = vector.extract_strided_slice %38 {offsets = [7, 0, 0], sizes = [1, 2, 128], strides = [1, 1, 1]} : vector<8x2x128xf32> to vector<1x2x128xf32>
    %67 = vector.shape_cast %66 : vector<1x2x128xf32> to vector<2x128xf32>
    %68 = vector.shape_cast %57 : vector<1x128xi1> to vector<1x128xi1>
    %69 = vector.broadcast %68 : vector<1x128xi1> to vector<2x128xi1>
    %70 = arith.select %69, %65, %67 : vector<2x128xi1>, vector<2x128xf32>
    %cst_30 = arith.constant dense<0.000000e+00> : vector<2x128xf32>
    %71 = tpu.matmul %62, %61, %cst_30 {dimension_numbers = #tpu.dot_dimension_numbers<[1], [0], [0], [1], [0, 0, 1, 1], [], []>} : vector<2x32xf32>, vector<32x128xf32>, vector<2x128xf32> -> vector<2x128xf32>
    %72 = arith.addf %70, %71 : vector<2x128xf32>
    %73 = vector.extract_strided_slice %72 {offsets = [0, 0], sizes = [2, 32], strides = [1, 1]} : vector<2x128xf32> to vector<2x32xf32>
    %74 = arith.negf %73 : vector<2x32xf32>
    %75 = math.exp %74 : vector<2x32xf32>
    %cst_31 = arith.constant 1.000000e+00 : f32
    %76 = vector.broadcast %cst_31 : f32 to vector<2x32xf32>
    %77 = arith.addf %76, %75 : vector<2x32xf32>
    %78 = arith.divf %76, %77 : vector<2x32xf32>
    %79 = vector.extract_strided_slice %72 {offsets = [0, 32], sizes = [2, 32], strides = [1, 1]} : vector<2x128xf32> to vector<2x32xf32>
    %80 = arith.negf %79 : vector<2x32xf32>
    %81 = math.exp %80 : vector<2x32xf32>
    %cst_32 = arith.constant 1.000000e+00 : f32
    %82 = vector.broadcast %cst_32 : f32 to vector<2x32xf32>
    %83 = arith.addf %82, %81 : vector<2x32xf32>
    %84 = arith.divf %82, %83 : vector<2x32xf32>
    %85 = vector.extract_strided_slice %72 {offsets = [0, 64], sizes = [2, 32], strides = [1, 1]} : vector<2x128xf32> to vector<2x32xf32>
    %86 = math.tanh %85 : vector<2x32xf32>
    %87 = vector.extract_strided_slice %72 {offsets = [0, 96], sizes = [2, 32], strides = [1, 1]} : vector<2x128xf32> to vector<2x32xf32>
    %88 = arith.negf %87 : vector<2x32xf32>
    %89 = math.exp %88 : vector<2x32xf32>
    %cst_33 = arith.constant 1.000000e+00 : f32
    %90 = vector.broadcast %cst_33 : f32 to vector<2x32xf32>
    %91 = arith.addf %90, %89 : vector<2x32xf32>
    %92 = arith.divf %90, %91 : vector<2x32xf32>
    %93 = arith.mulf %84, %63 : vector<2x32xf32>
    %94 = arith.mulf %78, %86 : vector<2x32xf32>
    %95 = arith.addf %93, %94 : vector<2x32xf32>
    %96 = math.tanh %95 : vector<2x32xf32>
    %97 = arith.mulf %92, %96 : vector<2x32xf32>
    %98 = vector.extract_strided_slice %38 {offsets = [1, 0, 0], sizes = [1, 2, 128], strides = [1, 1, 1]} : vector<8x2x128xf32> to vector<1x2x128xf32>
    %99 = vector.shape_cast %98 : vector<1x2x128xf32> to vector<2x128xf32>
    %100 = vector.extract_strided_slice %38 {offsets = [6, 0, 0], sizes = [1, 2, 128], strides = [1, 1, 1]} : vector<8x2x128xf32> to vector<1x2x128xf32>
    %101 = vector.shape_cast %100 : vector<1x2x128xf32> to vector<2x128xf32>
    %102 = vector.shape_cast %57 : vector<1x128xi1> to vector<1x128xi1>
    %103 = vector.broadcast %102 : vector<1x128xi1> to vector<2x128xi1>
    %104 = arith.select %103, %99, %101 : vector<2x128xi1>, vector<2x128xf32>
    %cst_34 = arith.constant dense<0.000000e+00> : vector<2x128xf32>
    %105 = tpu.matmul %97, %61, %cst_34 {dimension_numbers = #tpu.dot_dimension_numbers<[1], [0], [0], [1], [0, 0, 1, 1], [], []>} : vector<2x32xf32>, vector<32x128xf32>, vector<2x128xf32> -> vector<2x128xf32>
    %106 = arith.addf %104, %105 : vector<2x128xf32>
    %107 = vector.extract_strided_slice %106 {offsets = [0, 0], sizes = [2, 32], strides = [1, 1]} : vector<2x128xf32> to vector<2x32xf32>
    %108 = arith.negf %107 : vector<2x32xf32>
    %109 = math.exp %108 : vector<2x32xf32>
    %cst_35 = arith.constant 1.000000e+00 : f32
    %110 = vector.broadcast %cst_35 : f32 to vector<2x32xf32>
    %111 = arith.addf %110, %109 : vector<2x32xf32>
    %112 = arith.divf %110, %111 : vector<2x32xf32>
    %113 = vector.extract_strided_slice %106 {offsets = [0, 32], sizes = [2, 32], strides = [1, 1]} : vector<2x128xf32> to vector<2x32xf32>
    %114 = arith.negf %113 : vector<2x32xf32>
    %115 = math.exp %114 : vector<2x32xf32>
    %cst_36 = arith.constant 1.000000e+00 : f32
    %116 = vector.broadcast %cst_36 : f32 to vector<2x32xf32>
    %117 = arith.addf %116, %115 : vector<2x32xf32>
    %118 = arith.divf %116, %117 : vector<2x32xf32>
    %119 = vector.extract_strided_slice %106 {offsets = [0, 64], sizes = [2, 32], strides = [1, 1]} : vector<2x128xf32> to vector<2x32xf32>
    %120 = math.tanh %119 : vector<2x32xf32>
    %121 = vector.extract_strided_slice %106 {offsets = [0, 96], sizes = [2, 32], strides = [1, 1]} : vector<2x128xf32> to vector<2x32xf32>
    %122 = arith.negf %121 : vector<2x32xf32>
    %123 = math.exp %122 : vector<2x32xf32>
    %cst_37 = arith.constant 1.000000e+00 : f32
    %124 = vector.broadcast %cst_37 : f32 to vector<2x32xf32>
    %125 = arith.addf %124, %123 : vector<2x32xf32>
    %126 = arith.divf %124, %125 : vector<2x32xf32>
    %127 = arith.mulf %118, %95 : vector<2x32xf32>
    %128 = arith.mulf %112, %120 : vector<2x32xf32>
    %129 = arith.addf %127, %128 : vector<2x32xf32>
    %130 = math.tanh %129 : vector<2x32xf32>
    %131 = arith.mulf %126, %130 : vector<2x32xf32>
    %132 = vector.extract_strided_slice %38 {offsets = [2, 0, 0], sizes = [1, 2, 128], strides = [1, 1, 1]} : vector<8x2x128xf32> to vector<1x2x128xf32>
    %133 = vector.shape_cast %132 : vector<1x2x128xf32> to vector<2x128xf32>
    %134 = vector.extract_strided_slice %38 {offsets = [5, 0, 0], sizes = [1, 2, 128], strides = [1, 1, 1]} : vector<8x2x128xf32> to vector<1x2x128xf32>
    %135 = vector.shape_cast %134 : vector<1x2x128xf32> to vector<2x128xf32>
    %136 = vector.shape_cast %57 : vector<1x128xi1> to vector<1x128xi1>
    %137 = vector.broadcast %136 : vector<1x128xi1> to vector<2x128xi1>
    %138 = arith.select %137, %133, %135 : vector<2x128xi1>, vector<2x128xf32>
    %cst_38 = arith.constant dense<0.000000e+00> : vector<2x128xf32>
    %139 = tpu.matmul %131, %61, %cst_38 {dimension_numbers = #tpu.dot_dimension_numbers<[1], [0], [0], [1], [0, 0, 1, 1], [], []>} : vector<2x32xf32>, vector<32x128xf32>, vector<2x128xf32> -> vector<2x128xf32>
    %140 = arith.addf %138, %139 : vector<2x128xf32>
    %141 = vector.extract_strided_slice %140 {offsets = [0, 0], sizes = [2, 32], strides = [1, 1]} : vector<2x128xf32> to vector<2x32xf32>
    %142 = arith.negf %141 : vector<2x32xf32>
    %143 = math.exp %142 : vector<2x32xf32>
    %cst_39 = arith.constant 1.000000e+00 : f32
    %144 = vector.broadcast %cst_39 : f32 to vector<2x32xf32>
    %145 = arith.addf %144, %143 : vector<2x32xf32>
    %146 = arith.divf %144, %145 : vector<2x32xf32>
    %147 = vector.extract_strided_slice %140 {offsets = [0, 32], sizes = [2, 32], strides = [1, 1]} : vector<2x128xf32> to vector<2x32xf32>
    %148 = arith.negf %147 : vector<2x32xf32>
    %149 = math.exp %148 : vector<2x32xf32>
    %cst_40 = arith.constant 1.000000e+00 : f32
    %150 = vector.broadcast %cst_40 : f32 to vector<2x32xf32>
    %151 = arith.addf %150, %149 : vector<2x32xf32>
    %152 = arith.divf %150, %151 : vector<2x32xf32>
    %153 = vector.extract_strided_slice %140 {offsets = [0, 64], sizes = [2, 32], strides = [1, 1]} : vector<2x128xf32> to vector<2x32xf32>
    %154 = math.tanh %153 : vector<2x32xf32>
    %155 = vector.extract_strided_slice %140 {offsets = [0, 96], sizes = [2, 32], strides = [1, 1]} : vector<2x128xf32> to vector<2x32xf32>
    %156 = arith.negf %155 : vector<2x32xf32>
    %157 = math.exp %156 : vector<2x32xf32>
    %cst_41 = arith.constant 1.000000e+00 : f32
    %158 = vector.broadcast %cst_41 : f32 to vector<2x32xf32>
    %159 = arith.addf %158, %157 : vector<2x32xf32>
    %160 = arith.divf %158, %159 : vector<2x32xf32>
    %161 = arith.mulf %152, %129 : vector<2x32xf32>
    %162 = arith.mulf %146, %154 : vector<2x32xf32>
    %163 = arith.addf %161, %162 : vector<2x32xf32>
    %164 = math.tanh %163 : vector<2x32xf32>
    %165 = arith.mulf %160, %164 : vector<2x32xf32>
    %166 = vector.extract_strided_slice %38 {offsets = [3, 0, 0], sizes = [1, 2, 128], strides = [1, 1, 1]} : vector<8x2x128xf32> to vector<1x2x128xf32>
    %167 = vector.shape_cast %166 : vector<1x2x128xf32> to vector<2x128xf32>
    %168 = vector.extract_strided_slice %38 {offsets = [4, 0, 0], sizes = [1, 2, 128], strides = [1, 1, 1]} : vector<8x2x128xf32> to vector<1x2x128xf32>
    %169 = vector.shape_cast %168 : vector<1x2x128xf32> to vector<2x128xf32>
    %170 = vector.shape_cast %57 : vector<1x128xi1> to vector<1x128xi1>
    %171 = vector.broadcast %170 : vector<1x128xi1> to vector<2x128xi1>
    %172 = arith.select %171, %167, %169 : vector<2x128xi1>, vector<2x128xf32>
    %cst_42 = arith.constant dense<0.000000e+00> : vector<2x128xf32>
    %173 = tpu.matmul %165, %61, %cst_42 {dimension_numbers = #tpu.dot_dimension_numbers<[1], [0], [0], [1], [0, 0, 1, 1], [], []>} : vector<2x32xf32>, vector<32x128xf32>, vector<2x128xf32> -> vector<2x128xf32>
    %174 = arith.addf %172, %173 : vector<2x128xf32>
    %175 = vector.extract_strided_slice %174 {offsets = [0, 0], sizes = [2, 32], strides = [1, 1]} : vector<2x128xf32> to vector<2x32xf32>
    %176 = arith.negf %175 : vector<2x32xf32>
    %177 = math.exp %176 : vector<2x32xf32>
    %cst_43 = arith.constant 1.000000e+00 : f32
    %178 = vector.broadcast %cst_43 : f32 to vector<2x32xf32>
    %179 = arith.addf %178, %177 : vector<2x32xf32>
    %180 = arith.divf %178, %179 : vector<2x32xf32>
    %181 = vector.extract_strided_slice %174 {offsets = [0, 32], sizes = [2, 32], strides = [1, 1]} : vector<2x128xf32> to vector<2x32xf32>
    %182 = arith.negf %181 : vector<2x32xf32>
    %183 = math.exp %182 : vector<2x32xf32>
    %cst_44 = arith.constant 1.000000e+00 : f32
    %184 = vector.broadcast %cst_44 : f32 to vector<2x32xf32>
    %185 = arith.addf %184, %183 : vector<2x32xf32>
    %186 = arith.divf %184, %185 : vector<2x32xf32>
    %187 = vector.extract_strided_slice %174 {offsets = [0, 64], sizes = [2, 32], strides = [1, 1]} : vector<2x128xf32> to vector<2x32xf32>
    %188 = math.tanh %187 : vector<2x32xf32>
    %189 = vector.extract_strided_slice %174 {offsets = [0, 96], sizes = [2, 32], strides = [1, 1]} : vector<2x128xf32> to vector<2x32xf32>
    %190 = arith.negf %189 : vector<2x32xf32>
    %191 = math.exp %190 : vector<2x32xf32>
    %cst_45 = arith.constant 1.000000e+00 : f32
    %192 = vector.broadcast %cst_45 : f32 to vector<2x32xf32>
    %193 = arith.addf %192, %191 : vector<2x32xf32>
    %194 = arith.divf %192, %193 : vector<2x32xf32>
    %195 = arith.mulf %186, %163 : vector<2x32xf32>
    %196 = arith.mulf %180, %188 : vector<2x32xf32>
    %197 = arith.addf %195, %196 : vector<2x32xf32>
    %198 = math.tanh %197 : vector<2x32xf32>
    %199 = arith.mulf %194, %198 : vector<2x32xf32>
    %200 = vector.extract_strided_slice %38 {offsets = [4, 0, 0], sizes = [1, 2, 128], strides = [1, 1, 1]} : vector<8x2x128xf32> to vector<1x2x128xf32>
    %201 = vector.shape_cast %200 : vector<1x2x128xf32> to vector<2x128xf32>
    %202 = vector.extract_strided_slice %38 {offsets = [3, 0, 0], sizes = [1, 2, 128], strides = [1, 1, 1]} : vector<8x2x128xf32> to vector<1x2x128xf32>
    %203 = vector.shape_cast %202 : vector<1x2x128xf32> to vector<2x128xf32>
    %204 = vector.shape_cast %57 : vector<1x128xi1> to vector<1x128xi1>
    %205 = vector.broadcast %204 : vector<1x128xi1> to vector<2x128xi1>
    %206 = arith.select %205, %201, %203 : vector<2x128xi1>, vector<2x128xf32>
    %cst_46 = arith.constant dense<0.000000e+00> : vector<2x128xf32>
    %207 = tpu.matmul %199, %61, %cst_46 {dimension_numbers = #tpu.dot_dimension_numbers<[1], [0], [0], [1], [0, 0, 1, 1], [], []>} : vector<2x32xf32>, vector<32x128xf32>, vector<2x128xf32> -> vector<2x128xf32>
    %208 = arith.addf %206, %207 : vector<2x128xf32>
    %209 = vector.extract_strided_slice %208 {offsets = [0, 0], sizes = [2, 32], strides = [1, 1]} : vector<2x128xf32> to vector<2x32xf32>
    %210 = arith.negf %209 : vector<2x32xf32>
    %211 = math.exp %210 : vector<2x32xf32>
    %cst_47 = arith.constant 1.000000e+00 : f32
    %212 = vector.broadcast %cst_47 : f32 to vector<2x32xf32>
    %213 = arith.addf %212, %211 : vector<2x32xf32>
    %214 = arith.divf %212, %213 : vector<2x32xf32>
    %215 = vector.extract_strided_slice %208 {offsets = [0, 32], sizes = [2, 32], strides = [1, 1]} : vector<2x128xf32> to vector<2x32xf32>
    %216 = arith.negf %215 : vector<2x32xf32>
    %217 = math.exp %216 : vector<2x32xf32>
    %cst_48 = arith.constant 1.000000e+00 : f32
    %218 = vector.broadcast %cst_48 : f32 to vector<2x32xf32>
    %219 = arith.addf %218, %217 : vector<2x32xf32>
    %220 = arith.divf %218, %219 : vector<2x32xf32>
    %221 = vector.extract_strided_slice %208 {offsets = [0, 64], sizes = [2, 32], strides = [1, 1]} : vector<2x128xf32> to vector<2x32xf32>
    %222 = math.tanh %221 : vector<2x32xf32>
    %223 = vector.extract_strided_slice %208 {offsets = [0, 96], sizes = [2, 32], strides = [1, 1]} : vector<2x128xf32> to vector<2x32xf32>
    %224 = arith.negf %223 : vector<2x32xf32>
    %225 = math.exp %224 : vector<2x32xf32>
    %cst_49 = arith.constant 1.000000e+00 : f32
    %226 = vector.broadcast %cst_49 : f32 to vector<2x32xf32>
    %227 = arith.addf %226, %225 : vector<2x32xf32>
    %228 = arith.divf %226, %227 : vector<2x32xf32>
    %229 = arith.mulf %220, %197 : vector<2x32xf32>
    %230 = arith.mulf %214, %222 : vector<2x32xf32>
    %231 = arith.addf %229, %230 : vector<2x32xf32>
    %232 = math.tanh %231 : vector<2x32xf32>
    %233 = arith.mulf %228, %232 : vector<2x32xf32>
    %234 = vector.extract_strided_slice %38 {offsets = [5, 0, 0], sizes = [1, 2, 128], strides = [1, 1, 1]} : vector<8x2x128xf32> to vector<1x2x128xf32>
    %235 = vector.shape_cast %234 : vector<1x2x128xf32> to vector<2x128xf32>
    %236 = vector.extract_strided_slice %38 {offsets = [2, 0, 0], sizes = [1, 2, 128], strides = [1, 1, 1]} : vector<8x2x128xf32> to vector<1x2x128xf32>
    %237 = vector.shape_cast %236 : vector<1x2x128xf32> to vector<2x128xf32>
    %238 = vector.shape_cast %57 : vector<1x128xi1> to vector<1x128xi1>
    %239 = vector.broadcast %238 : vector<1x128xi1> to vector<2x128xi1>
    %240 = arith.select %239, %235, %237 : vector<2x128xi1>, vector<2x128xf32>
    %cst_50 = arith.constant dense<0.000000e+00> : vector<2x128xf32>
    %241 = tpu.matmul %233, %61, %cst_50 {dimension_numbers = #tpu.dot_dimension_numbers<[1], [0], [0], [1], [0, 0, 1, 1], [], []>} : vector<2x32xf32>, vector<32x128xf32>, vector<2x128xf32> -> vector<2x128xf32>
    %242 = arith.addf %240, %241 : vector<2x128xf32>
    %243 = vector.extract_strided_slice %242 {offsets = [0, 0], sizes = [2, 32], strides = [1, 1]} : vector<2x128xf32> to vector<2x32xf32>
    %244 = arith.negf %243 : vector<2x32xf32>
    %245 = math.exp %244 : vector<2x32xf32>
    %cst_51 = arith.constant 1.000000e+00 : f32
    %246 = vector.broadcast %cst_51 : f32 to vector<2x32xf32>
    %247 = arith.addf %246, %245 : vector<2x32xf32>
    %248 = arith.divf %246, %247 : vector<2x32xf32>
    %249 = vector.extract_strided_slice %242 {offsets = [0, 32], sizes = [2, 32], strides = [1, 1]} : vector<2x128xf32> to vector<2x32xf32>
    %250 = arith.negf %249 : vector<2x32xf32>
    %251 = math.exp %250 : vector<2x32xf32>
    %cst_52 = arith.constant 1.000000e+00 : f32
    %252 = vector.broadcast %cst_52 : f32 to vector<2x32xf32>
    %253 = arith.addf %252, %251 : vector<2x32xf32>
    %254 = arith.divf %252, %253 : vector<2x32xf32>
    %255 = vector.extract_strided_slice %242 {offsets = [0, 64], sizes = [2, 32], strides = [1, 1]} : vector<2x128xf32> to vector<2x32xf32>
    %256 = math.tanh %255 : vector<2x32xf32>
    %257 = vector.extract_strided_slice %242 {offsets = [0, 96], sizes = [2, 32], strides = [1, 1]} : vector<2x128xf32> to vector<2x32xf32>
    %258 = arith.negf %257 : vector<2x32xf32>
    %259 = math.exp %258 : vector<2x32xf32>
    %cst_53 = arith.constant 1.000000e+00 : f32
    %260 = vector.broadcast %cst_53 : f32 to vector<2x32xf32>
    %261 = arith.addf %260, %259 : vector<2x32xf32>
    %262 = arith.divf %260, %261 : vector<2x32xf32>
    %263 = arith.mulf %254, %231 : vector<2x32xf32>
    %264 = arith.mulf %248, %256 : vector<2x32xf32>
    %265 = arith.addf %263, %264 : vector<2x32xf32>
    %266 = math.tanh %265 : vector<2x32xf32>
    %267 = arith.mulf %262, %266 : vector<2x32xf32>
    %268 = vector.extract_strided_slice %38 {offsets = [6, 0, 0], sizes = [1, 2, 128], strides = [1, 1, 1]} : vector<8x2x128xf32> to vector<1x2x128xf32>
    %269 = vector.shape_cast %268 : vector<1x2x128xf32> to vector<2x128xf32>
    %270 = vector.extract_strided_slice %38 {offsets = [1, 0, 0], sizes = [1, 2, 128], strides = [1, 1, 1]} : vector<8x2x128xf32> to vector<1x2x128xf32>
    %271 = vector.shape_cast %270 : vector<1x2x128xf32> to vector<2x128xf32>
    %272 = vector.shape_cast %57 : vector<1x128xi1> to vector<1x128xi1>
    %273 = vector.broadcast %272 : vector<1x128xi1> to vector<2x128xi1>
    %274 = arith.select %273, %269, %271 : vector<2x128xi1>, vector<2x128xf32>
    %cst_54 = arith.constant dense<0.000000e+00> : vector<2x128xf32>
    %275 = tpu.matmul %267, %61, %cst_54 {dimension_numbers = #tpu.dot_dimension_numbers<[1], [0], [0], [1], [0, 0, 1, 1], [], []>} : vector<2x32xf32>, vector<32x128xf32>, vector<2x128xf32> -> vector<2x128xf32>
    %276 = arith.addf %274, %275 : vector<2x128xf32>
    %277 = vector.extract_strided_slice %276 {offsets = [0, 0], sizes = [2, 32], strides = [1, 1]} : vector<2x128xf32> to vector<2x32xf32>
    %278 = arith.negf %277 : vector<2x32xf32>
    %279 = math.exp %278 : vector<2x32xf32>
    %cst_55 = arith.constant 1.000000e+00 : f32
    %280 = vector.broadcast %cst_55 : f32 to vector<2x32xf32>
    %281 = arith.addf %280, %279 : vector<2x32xf32>
    %282 = arith.divf %280, %281 : vector<2x32xf32>
    %283 = vector.extract_strided_slice %276 {offsets = [0, 32], sizes = [2, 32], strides = [1, 1]} : vector<2x128xf32> to vector<2x32xf32>
    %284 = arith.negf %283 : vector<2x32xf32>
    %285 = math.exp %284 : vector<2x32xf32>
    %cst_56 = arith.constant 1.000000e+00 : f32
    %286 = vector.broadcast %cst_56 : f32 to vector<2x32xf32>
    %287 = arith.addf %286, %285 : vector<2x32xf32>
    %288 = arith.divf %286, %287 : vector<2x32xf32>
    %289 = vector.extract_strided_slice %276 {offsets = [0, 64], sizes = [2, 32], strides = [1, 1]} : vector<2x128xf32> to vector<2x32xf32>
    %290 = math.tanh %289 : vector<2x32xf32>
    %291 = vector.extract_strided_slice %276 {offsets = [0, 96], sizes = [2, 32], strides = [1, 1]} : vector<2x128xf32> to vector<2x32xf32>
    %292 = arith.negf %291 : vector<2x32xf32>
    %293 = math.exp %292 : vector<2x32xf32>
    %cst_57 = arith.constant 1.000000e+00 : f32
    %294 = vector.broadcast %cst_57 : f32 to vector<2x32xf32>
    %295 = arith.addf %294, %293 : vector<2x32xf32>
    %296 = arith.divf %294, %295 : vector<2x32xf32>
    %297 = arith.mulf %288, %265 : vector<2x32xf32>
    %298 = arith.mulf %282, %290 : vector<2x32xf32>
    %299 = arith.addf %297, %298 : vector<2x32xf32>
    %300 = math.tanh %299 : vector<2x32xf32>
    %301 = arith.mulf %296, %300 : vector<2x32xf32>
    %302 = vector.extract_strided_slice %38 {offsets = [7, 0, 0], sizes = [1, 2, 128], strides = [1, 1, 1]} : vector<8x2x128xf32> to vector<1x2x128xf32>
    %303 = vector.shape_cast %302 : vector<1x2x128xf32> to vector<2x128xf32>
    %304 = vector.extract_strided_slice %38 {offsets = [0, 0, 0], sizes = [1, 2, 128], strides = [1, 1, 1]} : vector<8x2x128xf32> to vector<1x2x128xf32>
    %305 = vector.shape_cast %304 : vector<1x2x128xf32> to vector<2x128xf32>
    %306 = vector.shape_cast %57 : vector<1x128xi1> to vector<1x128xi1>
    %307 = vector.broadcast %306 : vector<1x128xi1> to vector<2x128xi1>
    %308 = arith.select %307, %303, %305 : vector<2x128xi1>, vector<2x128xf32>
    %cst_58 = arith.constant dense<0.000000e+00> : vector<2x128xf32>
    %309 = tpu.matmul %301, %61, %cst_58 {dimension_numbers = #tpu.dot_dimension_numbers<[1], [0], [0], [1], [0, 0, 1, 1], [], []>} : vector<2x32xf32>, vector<32x128xf32>, vector<2x128xf32> -> vector<2x128xf32>
    %310 = arith.addf %308, %309 : vector<2x128xf32>
    %311 = vector.extract_strided_slice %310 {offsets = [0, 0], sizes = [2, 32], strides = [1, 1]} : vector<2x128xf32> to vector<2x32xf32>
    %312 = arith.negf %311 : vector<2x32xf32>
    %313 = math.exp %312 : vector<2x32xf32>
    %cst_59 = arith.constant 1.000000e+00 : f32
    %314 = vector.broadcast %cst_59 : f32 to vector<2x32xf32>
    %315 = arith.addf %314, %313 : vector<2x32xf32>
    %316 = arith.divf %314, %315 : vector<2x32xf32>
    %317 = vector.extract_strided_slice %310 {offsets = [0, 32], sizes = [2, 32], strides = [1, 1]} : vector<2x128xf32> to vector<2x32xf32>
    %318 = arith.negf %317 : vector<2x32xf32>
    %319 = math.exp %318 : vector<2x32xf32>
    %cst_60 = arith.constant 1.000000e+00 : f32
    %320 = vector.broadcast %cst_60 : f32 to vector<2x32xf32>
    %321 = arith.addf %320, %319 : vector<2x32xf32>
    %322 = arith.divf %320, %321 : vector<2x32xf32>
    %323 = vector.extract_strided_slice %310 {offsets = [0, 64], sizes = [2, 32], strides = [1, 1]} : vector<2x128xf32> to vector<2x32xf32>
    %324 = math.tanh %323 : vector<2x32xf32>
    %325 = vector.extract_strided_slice %310 {offsets = [0, 96], sizes = [2, 32], strides = [1, 1]} : vector<2x128xf32> to vector<2x32xf32>
    %326 = arith.negf %325 : vector<2x32xf32>
    %327 = math.exp %326 : vector<2x32xf32>
    %cst_61 = arith.constant 1.000000e+00 : f32
    %328 = vector.broadcast %cst_61 : f32 to vector<2x32xf32>
    %329 = arith.addf %328, %327 : vector<2x32xf32>
    %330 = arith.divf %328, %329 : vector<2x32xf32>
    %331 = arith.mulf %322, %299 : vector<2x32xf32>
    %332 = arith.mulf %316, %324 : vector<2x32xf32>
    %333 = arith.addf %331, %332 : vector<2x32xf32>
    %334 = math.tanh %333 : vector<2x32xf32>
    %335 = arith.mulf %330, %334 : vector<2x32xf32>
    %336 = vector.shape_cast %60 : vector<1x32xi1> to vector<1x32xi1>
    %337 = vector.broadcast %336 : vector<1x32xi1> to vector<2x32xi1>
    %338 = arith.select %337, %97, %335 : vector<2x32xi1>, vector<2x32xf32>
    %339 = vector.shape_cast %60 : vector<1x32xi1> to vector<1x32xi1>
    %340 = vector.broadcast %339 : vector<1x32xi1> to vector<2x32xi1>
    %341 = arith.select %340, %131, %301 : vector<2x32xi1>, vector<2x32xf32>
    %342 = vector.shape_cast %60 : vector<1x32xi1> to vector<1x32xi1>
    %343 = vector.broadcast %342 : vector<1x32xi1> to vector<2x32xi1>
    %344 = arith.select %343, %165, %267 : vector<2x32xi1>, vector<2x32xf32>
    %345 = vector.shape_cast %60 : vector<1x32xi1> to vector<1x32xi1>
    %346 = vector.broadcast %345 : vector<1x32xi1> to vector<2x32xi1>
    %347 = arith.select %346, %199, %233 : vector<2x32xi1>, vector<2x32xf32>
    %348 = vector.shape_cast %60 : vector<1x32xi1> to vector<1x32xi1>
    %349 = vector.broadcast %348 : vector<1x32xi1> to vector<2x32xi1>
    %350 = arith.select %349, %233, %199 : vector<2x32xi1>, vector<2x32xf32>
    %351 = vector.shape_cast %60 : vector<1x32xi1> to vector<1x32xi1>
    %352 = vector.broadcast %351 : vector<1x32xi1> to vector<2x32xi1>
    %353 = arith.select %352, %267, %165 : vector<2x32xi1>, vector<2x32xf32>
    %354 = vector.shape_cast %60 : vector<1x32xi1> to vector<1x32xi1>
    %355 = vector.broadcast %354 : vector<1x32xi1> to vector<2x32xi1>
    %356 = arith.select %355, %301, %131 : vector<2x32xi1>, vector<2x32xf32>
    %357 = vector.shape_cast %60 : vector<1x32xi1> to vector<1x32xi1>
    %358 = vector.broadcast %357 : vector<1x32xi1> to vector<2x32xi1>
    %359 = arith.select %358, %335, %97 : vector<2x32xi1>, vector<2x32xf32>
    %360 = vector.shape_cast %338 : vector<2x32xf32> to vector<1x2x32xf32>
    %361 = vector.shape_cast %341 : vector<2x32xf32> to vector<1x2x32xf32>
    %362 = vector.shape_cast %344 : vector<2x32xf32> to vector<1x2x32xf32>
    %363 = vector.shape_cast %347 : vector<2x32xf32> to vector<1x2x32xf32>
    %364 = vector.shape_cast %350 : vector<2x32xf32> to vector<1x2x32xf32>
    %365 = vector.shape_cast %353 : vector<2x32xf32> to vector<1x2x32xf32>
    %366 = vector.shape_cast %356 : vector<2x32xf32> to vector<1x2x32xf32>
    %367 = vector.shape_cast %359 : vector<2x32xf32> to vector<1x2x32xf32>
    %368 = tpu.concatenate %360, %361, %362, %363, %364, %365, %366, %367 in 0 : vector<1x2x32xf32>, vector<1x2x32xf32>, vector<1x2x32xf32>, vector<1x2x32xf32>, vector<1x2x32xf32>, vector<1x2x32xf32>, vector<1x2x32xf32>, vector<1x2x32xf32> -> vector<8x2x32xf32>
    %c0_62 = arith.constant 0 : index
    %c0_63 = arith.constant 0 : index
    %369 = vector.load %arg8[%c0_62, %c0_63] : memref<32x32xf32, #tpu.memory_space<vmem>>, vector<32x32xf32>
    "tpu.trace_start"() <{level = 10 : i32, message = "tbd,de->tbe"}> : () -> ()
    %cst_64 = arith.constant dense<0.000000e+00> : vector<8x2x32xf32>
    %370 = tpu.matmul %368, %369, %cst_64 {dimension_numbers = #tpu.dot_dimension_numbers<[2], [0], [0, 1], [1], [0, 0, 0, 1, 1, 1], [], []>} : vector<8x2x32xf32>, vector<32x32xf32>, vector<8x2x32xf32> -> vector<8x2x32xf32>
    "tpu.trace_stop"() : () -> ()
    %371 = math.tanh %370 : vector<8x2x32xf32>
    %c0_65 = arith.constant 0 : index
    %c0_66 = arith.constant 0 : index
    %c0_67 = arith.constant 0 : index
    %372 = vector.load %arg9[%c0_65, %c0_66, %c0_67] : memref<1x1x32xf32, #tpu.memory_space<vmem>>, vector<1x1x32xf32>
    %373 = vector.broadcast %372 : vector<1x1x32xf32> to vector<8x2x32xf32>
    %374 = arith.mulf %371, %373 : vector<8x2x32xf32>
    %cst_68 = arith.constant dense<0.000000e+00> : vector<8x2xf32>
    %375 = vector.multi_reduction <add>, %374, %cst_68 [2] : vector<8x2x32xf32> to vector<8x2xf32>
    %376 = vector.shape_cast %375 : vector<8x2xf32> to vector<8x2x1xf32>
    %cst_69 = arith.constant dense<0xFF800000> : vector<2x1xf32>
    %377 = vector.multi_reduction <maximumf>, %376, %cst_69 [0] : vector<8x2x1xf32> to vector<2x1xf32>
    %378 = vector.shape_cast %377 : vector<2x1xf32> to vector<1x2x1xf32>
    %379 = vector.broadcast %378 : vector<1x2x1xf32> to vector<8x2x1xf32>
    %380 = arith.subf %376, %379 : vector<8x2x1xf32>
    %381 = math.exp %380 : vector<8x2x1xf32>
    %cst_70 = arith.constant dense<0.000000e+00> : vector<2x1xf32>
    %382 = vector.multi_reduction <add>, %381, %cst_70 [0] : vector<8x2x1xf32> to vector<2x1xf32>
    %383 = vector.shape_cast %382 : vector<2x1xf32> to vector<1x2x1xf32>
    %384 = vector.broadcast %383 : vector<1x2x1xf32> to vector<8x2x1xf32>
    %385 = arith.divf %381, %384 : vector<8x2x1xf32>
    %386 = vector.broadcast %385 : vector<8x2x1xf32> to vector<8x2x32xf32>
    %387 = arith.mulf %386, %368 : vector<8x2x32xf32>
    %cst_71 = arith.constant dense<0.000000e+00> : vector<2x32xf32>
    %388 = vector.multi_reduction <add>, %387, %cst_71 [0] : vector<8x2x32xf32> to vector<2x32xf32>
    %c0_72 = arith.constant 0 : index
    %c0_73 = arith.constant 0 : index
    %389 = vector.load %arg10[%c0_72, %c0_73] : memref<32x10xf32, #tpu.memory_space<vmem>>, vector<32x10xf32>
    %cst_74 = arith.constant dense<0.000000e+00> : vector<2x10xf32>
    %390 = tpu.matmul %388, %389, %cst_74 {dimension_numbers = #tpu.dot_dimension_numbers<[1], [0], [0], [1], [0, 0, 1, 1], [], []>} : vector<2x32xf32>, vector<32x10xf32>, vector<2x10xf32> -> vector<2x10xf32>
    %c0_75 = arith.constant 0 : index
    %c0_76 = arith.constant 0 : index
    %391 = vector.load %arg11[%c0_75, %c0_76] : memref<1x10xf32, #tpu.memory_space<vmem>>, vector<1x10xf32>
    %392 = vector.broadcast %391 : vector<1x10xf32> to vector<2x10xf32>
    %393 = arith.addf %390, %392 : vector<2x10xf32>
    %c0_77 = arith.constant 0 : index
    %c0_78 = arith.constant 0 : index
    %394 = vector.load %arg12[%c0_77, %c0_78] : memref<2x10xf32, #tpu.memory_space<vmem>>, vector<2x10xf32>
    tpu.vector_store %arg12[%c0_77, %c0_78], %393 {strides = array<i32>} : memref<2x10xf32, #tpu.memory_space<vmem>>, vector<2x10xf32>,
    return
  }
}

</mosaic_0001>

<bundles_post_ra>
// kernel: brainwavenet_forward.1
= control target key start
LH: loop header
LB: loop body
LE: loop exit
PB: predicated region body
PF: predicated region fallthrough
CT: control target
= control target key end

     0   :  { %s3342_s25 = smov 1   ;;  %s4478_s0 = inlined_call_operand.vmem [shape: f32[32,2,1], index: 0, kind: input, shape index: {}]   ;;  %s4479_s1 = inlined_call_operand.vmem [shape: f32[3,8], index: 1, kind: input, shape index: {}]   ;;  %s4480_s2 = inlined_call_operand.vmem [shape: f32[1,8], index: 2, kind: input, shape index: {}]   ;;  %s4481_s3 = inlined_call_operand.vmem [shape: f32[24,16], index: 3, kind: input, shape index: {}]   ;;  %s4482_s4 = inlined_call_operand.vmem [shape: f32[1,16], index: 4, kind: input, shape index: {}]   ;;  %s4483_s5 = inlined_call_operand.vmem [shape: f32[16,128], index: 5, kind: input, shape index: {}]   ;;  %s4484_s6 = inlined_call_operand.vmem [shape: f32[32,128], index: 6, kind: input, shape index: {}]   ;;  %s4485_s7 = inlined_call_operand.vmem [shape: f32[1,128], index: 7, kind: input, shape index: {}]   ;;  %s4486_s8 = inlined_call_operand.vmem [shape: f32[32,32], index: 8, kind: input, shape index: {}]   ;;  %s4487_s9 = inlined_call_operand.vmem [shape: f32[1,1,32], index: 9, kind: input, shape index: {}]   ;;  %s4488_s10 = inlined_call_operand.vmem [shape: f32[32,10], index: 10, kind: input, shape index: {}]   ;;  %s4489_s11 = inlined_call_operand.vmem [shape: f32[1,10], index: 11, kind: input, shape index: {}]   ;;  %s4490_s12 = inlined_call_operand.hbm [shape: f32[2,10], index: 12, kind: output, shape index: {}]  }
   0x1   :  { %v3420_v0 = vld [vmem:[%s4478_s0 + $0x4] sm:$0x3]  ;;  %v3425_v1 = vld [vmem:[%s4478_s0] sm:$0x3]  ;;  %v3434_v2 = vld [vmem:[%s4478_s0 + $0x6] sm:$0x3] }
   0x2   :  { %112 = vrot.lane.b32.xlu1 %v3420_v0, %s3342_s25  ;;  %108 = vrot.lane.b32.xlu0 %v3425_v1, %s3342_s25  ;;  %v3439_v3 = vld [vmem:[%s4478_s0 + $0x2] sm:$0x3]  ;;  %v3448_v4 = vld [vmem:[%s4478_s0 + $0xa] sm:$0x3] }
   0x3   :  { %v3453_v5 = vld [vmem:[%s4478_s0 + $0x8] sm:$0x3]  ;;  %v3462_v6 = vld [vmem:[%s4478_s0 + $0xe] sm:$0x3]  ;;  %v3467_v7 = vld [vmem:[%s4478_s0 + $0xc] sm:$0x3] }
   0x6   :  { %114 = vrot.lane.b32.xlu1 %v3434_v2, %s3342_s25  ;;  %110 = vrot.lane.b32.xlu0 %v3439_v3, %s3342_s25 }
   0xa   :  { %118 = vrot.lane.b32.xlu1 %v3448_v4, %s3342_s25  ;;  %116 = vrot.lane.b32.xlu0 %v3453_v5, %s3342_s25 }
   0xb   :  { %17 = vsyncpa [#allocation3], 0  ;;  %s3343_s20 = smov 2   ;;  %v74_v8 = vld [vmem:[%s4479_s1] sm:$0x7]  ;;  %vm567_vm0 = vcmask 1042432   ;;  %v409_v44 = vlaneseq }
   0xc   :  { %3069 = vmatprep.subr.msk.mxu0 %vm567_vm0, %v74_v8  ;;  %v3344_v9 = vmov 0.0   ;;  %v3492_v10 = vld [vmem:[%s4478_s0 + $0x10] sm:$0x3]  ;;  %v3501_v11 = vld [vmem:[%s4478_s0 + $0x12] sm:$0x3]  ;;  %vm301_vm1 = vcmask 7168  }
   0xd   :  { %3070 = vmatpush3.msk.msra.mxu0 %vm567_vm0, %v74_v8  ;;  %v3510_v12 = vld [vmem:[%s4478_s0 + $0x16] sm:$0x3]  ;;  %v3515_v13 = vld [vmem:[%s4478_s0 + $0x14] sm:$0x3]  ;;  %v3524_v14 = vld [vmem:[%s4478_s0 + $0x1a] sm:$0x3] }
   0xe   :  { %122 = vrot.lane.b32.xlu1 %v3462_v6, %s3342_s25  ;;  %120 = vrot.lane.b32.xlu0 %v3467_v7, %s3342_s25  ;;  %v3529_v15 = vld [vmem:[%s4478_s0 + $0x18] sm:$0x3]  ;;  %v3538_v16 = vld [vmem:[%s4478_s0 + $0x1e] sm:$0x3]  ;;  %v3345_v42 = vmov 1983009808  }
   0xf   :  { %3102 = vmatprep.subr.mxu0 %v3344_v9  ;;  %v3543_v17 = vld [vmem:[%s4478_s0 + $0x1c] sm:$0x3]  ;;  %v3564_v18 = vld [vmem:[%s4478_s0 + $0x20] sm:$0x3]  ;;  %v3573_v19 = vld [vmem:[%s4478_s0 + $0x22] sm:$0x3]  ;;  %v407_v43 = vunpack.c.l.s4 %v3345_v42 }
  0x10   :  { %v3582_v20 = vld [vmem:[%s4478_s0 + $0x26] sm:$0x3]  ;;  %v3587_v21 = vld [vmem:[%s4478_s0 + $0x24] sm:$0x3]  ;;  %v3596_v22 = vld [vmem:[%s4478_s0 + $0x2a] sm:$0x3] }
  0x11   :  { %v3601_v23 = vld [vmem:[%s4478_s0 + $0x28] sm:$0x3]  ;;  %v3610_v24 = vld [vmem:[%s4478_s0 + $0x2e] sm:$0x3]  ;;  %v3615_v25 = vld [vmem:[%s4478_s0 + $0x2c] sm:$0x3]  ;;  %v408_v49 = vunpack.c.0.s8 %v407_v43 }
  0x12   :  { %207 = vrot.lane.b32.xlu1 %v3420_v0, %s3343_s20  ;;  %205 = vrot.lane.b32.xlu0 %v3439_v3, %s3343_s20  ;;  %v3636_v26 = vld [vmem:[%s4478_s0 + $0x30] sm:$0x3]  ;;  %v3645_v27 = vld [vmem:[%s4478_s0 + $0x32] sm:$0x3]  ;;  %vm334_vm2 = vcmask 15360   ;;  %v410_v50 = vshrl.u32 %v409_v44, 7 }
  0x13   :  { %v3654_v28 = vld [vmem:[%s4478_s0 + $0x36] sm:$0x3]  ;;  %v3659_v29 = vld [vmem:[%s4478_s0 + $0x34] sm:$0x3]  ;;  %v3668_v30 = vld [vmem:[%s4478_s0 + $0x3a] sm:$0x3] }
  0x14   :  { %v3673_v31 = vld [vmem:[%s4478_s0 + $0x38] sm:$0x3]  ;;  %v73_v32 = vld [vmem:[%s4478_s0 + $0x3e] sm:$0x3]  ;;  %v3685_v33 = vld [vmem:[%s4478_s0 + $0x3c] sm:$0x3]  ;;  %v3715_v58 = vsub.s32 %v408_v49, %v410_v50 }
  0x15   :  { %vm550_vm3 = vcmask 23552   ;;  %vm884_vm4 = vcmask 58368   ;;  %vm1168_vm5 = vcmask 64512   ;;  %vm1185_vm6 = vcmask 130048   ;;  %s3351_s16 = smov [#allocation2]  }
  0x16   :  { %211 = vrot.lane.b32.xlu1 %v3453_v5, %s3343_s20  ;;  %209 = vrot.lane.b32.xlu0 %v3434_v2, %s3343_s20  ;;  %vm1301_vm7 = vcmask 195584   ;;  %vm3348_vm8 = vmmov 0   ;;  %vm1499_vm9 = vcmask 123904   ;;  %vm1730_vm11 = vcmask 261120  }
  0x17   :  { %vm2748_vm13 = vcmask 254976   ;;  %vm2773_vm14 = vcmask 1041408   ;;  %vm2944_vm15 = vcmask 74752  }
  0x1a   :  { %215 = vrot.lane.b32.xlu1 %v3467_v7, %s3343_s20  ;;  %213 = vrot.lane.b32.xlu0 %v3448_v4, %s3343_s20 }
  0x1e   :  { %219 = vrot.lane.b32.xlu1 %v3492_v10, %s3343_s20  ;;  %217 = vrot.lane.b32.xlu0 %v3462_v6, %s3343_s20 }
  0x22   :  { %126 = vrot.lane.b32.xlu1 %v3501_v11, %s3342_s25  ;;  %124 = vrot.lane.b32.xlu0 %v3492_v10, %s3342_s25 }
  0x26   :  { %130 = vrot.lane.b32.xlu1 %v3510_v12, %s3342_s25  ;;  %128 = vrot.lane.b32.xlu0 %v3515_v13, %s3342_s25 }
  0x2a   :  { %134 = vrot.lane.b32.xlu1 %v3524_v14, %s3342_s25  ;;  %132 = vrot.lane.b32.xlu0 %v3529_v15, %s3342_s25 }
  0x2e   :  { %138 = vrot.lane.b32.xlu1 %v3538_v16, %s3342_s25  ;;  %136 = vrot.lane.b32.xlu0 %v3543_v17, %s3342_s25 }
  0x32   :  { %223 = vrot.lane.b32.xlu1 %v3515_v13, %s3343_s20  ;;  %221 = vrot.lane.b32.xlu0 %v3501_v11, %s3343_s20 }
  0x36   :  { %227 = vrot.lane.b32.xlu1 %v3529_v15, %s3343_s20  ;;  %225 = vrot.lane.b32.xlu0 %v3510_v12, %s3343_s20 }
  0x3a   :  { %231 = vrot.lane.b32.xlu1 %v3543_v17, %s3343_s20  ;;  %229 = vrot.lane.b32.xlu0 %v3524_v14, %s3343_s20 }
  0x3e   :  { %235 = vrot.lane.b32.xlu1 %v3564_v18, %s3343_s20  ;;  %233 = vrot.lane.b32.xlu0 %v3538_v16, %s3343_s20 }
  0x42   :  { %142 = vrot.lane.b32.xlu1 %v3573_v19, %s3342_s25  ;;  %140 = vrot.lane.b32.xlu0 %v3564_v18, %s3342_s25 }
  0x46   :  { %146 = vrot.lane.b32.xlu1 %v3582_v20, %s3342_s25  ;;  %144 = vrot.lane.b32.xlu0 %v3587_v21, %s3342_s25 }
  0x4a   :  { %150 = vrot.lane.b32.xlu1 %v3596_v22, %s3342_s25  ;;  %148 = vrot.lane.b32.xlu0 %v3601_v23, %s3342_s25 }
  0x4e   :  { %154 = vrot.lane.b32.xlu1 %v3610_v24, %s3342_s25  ;;  %152 = vrot.lane.b32.xlu0 %v3615_v25, %s3342_s25 }
  0x52   :  { %239 = vrot.lane.b32.xlu1 %v3587_v21, %s3343_s20  ;;  %237 = vrot.lane.b32.xlu0 %v3573_v19, %s3343_s20 }
  0x56   :  { %243 = vrot.lane.b32.xlu1 %v3601_v23, %s3343_s20  ;;  %241 = vrot.lane.b32.xlu0 %v3582_v20, %s3343_s20 }
  0x5a   :  { %247 = vrot.lane.b32.xlu1 %v3615_v25, %s3343_s20  ;;  %245 = vrot.lane.b32.xlu0 %v3596_v22, %s3343_s20 }
  0x5e   :  { %251 = vrot.lane.b32.xlu1 %v3636_v26, %s3343_s20  ;;  %249 = vrot.lane.b32.xlu0 %v3610_v24, %s3343_s20 }
  0x62   :  { %158 = vrot.lane.b32.xlu1 %v3645_v27, %s3342_s25  ;;  %156 = vrot.lane.b32.xlu0 %v3636_v26, %s3342_s25 }
  0x66   :  { %162 = vrot.lane.b32.xlu1 %v3654_v28, %s3342_s25  ;;  %160 = vrot.lane.b32.xlu0 %v3659_v29, %s3342_s25 }
  0x6a   :  { %166 = vrot.lane.b32.xlu1 %v3668_v30, %s3342_s25  ;;  %164 = vrot.lane.b32.xlu0 %v3673_v31, %s3342_s25 }
  0x6e   :  { %170 = vrot.lane.b32.xlu1 %v73_v32, %s3342_s25  ;;  %168 = vrot.lane.b32.xlu0 %v3685_v33, %s3342_s25  ;;  %s3350_s25 = smov 32  }
  0x72   :  { %255 = vrot.lane.b32.xlu1 %v3659_v29, %s3343_s20  ;;  %253 = vrot.lane.b32.xlu0 %v3645_v27, %s3343_s20 }
  0x74   :  { %v113_v34 = vpop.permute.xlu1 %112  ;;  %v109_v35 = vpop.permute.xlu0 %108 }
  0x75   :  { %v302_v45 = vsel %vm301_vm1, 0.0, %v109_v35  ;;  %v304_v53 = vsel %vm301_vm1, %v3439_v3, %v113_v34 }
  0x76   :  { %259 = vrot.lane.b32.xlu1 %v3673_v31, %s3343_s20  ;;  %257 = vrot.lane.b32.xlu0 %v3654_v28, %s3343_s20 }
  0x78   :  { %v115_v36 = vpop.permute.xlu1 %114  ;;  %v111_v37 = vpop.permute.xlu0 %110 }
  0x79   :  { %v303_v46 = vsel %vm301_vm1, %v3425_v1, %v111_v37  ;;  %v305_v54 = vsel %vm301_vm1, %v3420_v0, %v115_v36 }
  0x7a   :  { %263 = vrot.lane.b32.xlu1 %v3685_v33, %s3343_s20  ;;  %261 = vrot.lane.b32.xlu0 %v3668_v30, %s3343_s20 }
  0x7c   :  { %v119_v38 = vpop.permute.xlu1 %118  ;;  %v117_v39 = vpop.permute.xlu0 %116 }
  0x7d   :  { %v307_v62 = vsel %vm301_vm1, %v3453_v5, %v119_v38  ;;  %v306_v63 = vsel %vm301_vm1, %v3434_v2, %v117_v39 }
  0x7e   :  { %267 = vrot.lane.b32.xlu1 %v3344_v9, %s3343_s20  ;;  %265 = vrot.lane.b32.xlu0 %v73_v32, %s3343_s20  ;;  %s3347_s20 = smov 8  }
  0x80   :  { %v123_v40 = vpop.permute.xlu1 %122  ;;  %v121_v41 = vpop.permute.xlu0 %120 }
  0x81   :  { %v309_v36 = vsel %vm301_vm1, %v3467_v7, %v123_v40  ;;  %v308_v5 = vsel %vm301_vm1, %v3448_v4, %v121_v41 }
  0x84   :  { %v208_v47 = vpop.permute.xlu1 %207  ;;  %v206_v48 = vpop.permute.xlu0 %205 }
  0x85   :  { %v336_v51 = vsel %vm334_vm2, %v303_v46, %v208_v47  ;;  %v335_v52 = vsel %vm334_vm2, %v302_v45, %v206_v48 }
  0x86   :  { %v404_v55 = vcombine.low %v335_v52, %v336_v51 }
  0x88   :  { %v212_v56 = vpop.permute.xlu1 %211  ;;  %v210_v57 = vpop.permute.xlu0 %209  ;;  %v412_v0 = vrot.slane %v404_v55, %v3715_v58 }
  0x89   :  { %v338_v59 = vsel %vm334_vm2, %v305_v54, %v212_v56  ;;  %v337_v60 = vsel %vm334_vm2, %v304_v53, %v210_v57 }
  0x8a   :  { %v405_v61 = vcombine.low %v337_v60, %v338_v59 }
  0x8c   :  { %v216_v1 = vpop.permute.xlu1 %215  ;;  %v214_v3 = vpop.permute.xlu0 %213  ;;  %v419_v8 = vrot.slane %v405_v61, %v3715_v58 }
  0x8d   :  { %v340_v32 = vsel %vm334_vm2, %v307_v62, %v216_v1  ;;  %v339_v34 = vsel %vm334_vm2, %v306_v63, %v214_v3 }
  0x8e   :  { %v420_v35 = vcombine.low %v412_v0, %v419_v8  ;;  %v421_v37 = vcombine.low %v339_v34, %v340_v32 }
  0x90   :  { %v220_v2 = vpop.permute.xlu1 %219  ;;  %3071 = vmatprep.mubr.msk.f32.mxu0 %vm550_vm3, %v420_v35  ;;  %v218_v38 = vpop.permute.xlu0 %217  ;;  %v429_v45 = vrot.slane %v421_v37, %v3715_v58 }
  0x91   :  { %v342_v39 = vsel %vm334_vm2, %v309_v36, %v220_v2  ;;  %v341_v42 = vsel %vm334_vm2, %v308_v5, %v218_v38 }
  0x92   :  { %v422_v43 = vcombine.low %v341_v42, %v342_v39 }
  0x94   :  { %v436_v46 = vrot.slane %v422_v43, %v3715_v58  ;;  %v127_v47 = vpop.permute.xlu1 %126  ;;  %v125_v48 = vpop.permute.xlu0 %124 }
  0x95   :  { %v311_v52 = vsel %vm301_vm1, %v3492_v10, %v127_v47  ;;  %v310_v53 = vsel %vm301_vm1, %v3462_v6, %v125_v48 }
  0x96   :  { %v437_v7 = vcombine.low %v429_v45, %v436_v46 }
  0x98   :  { %v131_v40 = vpop.permute.xlu1 %130  ;;  %3072 = vmatmul.mubr.msk.f32.vlgmr.msra.gmra.mxu0 %vm550_vm3, %v437_v7  ;;  %v129_v4 = vpop.permute.xlu0 %128 }
  0x99   :  { %v313_v59 = vsel %vm301_vm1, %v3515_v13, %v131_v40  ;;  %v312_v60 = vsel %vm301_vm1, %v3501_v11, %v129_v4 }
  0x9c   :  { %v135_v41 = vpop.permute.xlu1 %134  ;;  %v133_v49 = vpop.permute.xlu0 %132 }
  0x9d   :  { %v315_v3 = vsel %vm301_vm1, %v3529_v15, %v135_v41  ;;  %v314_v0 = vsel %vm301_vm1, %v3510_v12, %v133_v49 }
  0xa0   :  { %v139_v50 = vpop.permute.xlu1 %138  ;;  %v137_v51 = vpop.permute.xlu0 %136 }
  0xa1   :  { %v317_v5 = vsel %vm301_vm1, %v3543_v17, %v139_v50  ;;  %v316_v15 = vsel %vm301_vm1, %v3524_v14, %v137_v51 }
  0xa4   :  { %v224_v54 = vpop.permute.xlu1 %223  ;;  %v222_v55 = vpop.permute.xlu0 %221 }
  0xa5   :  { %v344_v56 = vsel %vm334_vm2, %v311_v52, %v224_v54  ;;  %v343_v57 = vsel %vm334_vm2, %v310_v53, %v222_v55 }
  0xa6   :  { %v438_v61 = vcombine.low %v343_v57, %v344_v56 }
  0xa8   :  { %v228_v62 = vpop.permute.xlu1 %227  ;;  %v226_v63 = vpop.permute.xlu0 %225  ;;  %v446_v8 = vrot.slane %v438_v61, %v3715_v58 }
  0xa9   :  { %v346_v10 = vsel %vm334_vm2, %v313_v59, %v228_v62  ;;  %v345_v1 = vsel %vm334_vm2, %v312_v60, %v226_v63 }
  0xaa   :  { %v439_v6 = vcombine.low %v345_v1, %v346_v10 }
  0xac   :  { %v453_v13 = vrot.slane %v439_v6, %v3715_v58  ;;  %v232_v32 = vpop.permute.xlu1 %231  ;;  %v230_v11 = vpop.permute.xlu0 %229 }
  0xad   :  { %v348_v34 = vsel %vm334_vm2, %v315_v3, %v232_v32  ;;  %v347_v35 = vsel %vm334_vm2, %v314_v0, %v230_v11 }
  0xae   :  { %v454_v36 = vcombine.low %v446_v8, %v453_v13  ;;  %v455_v37 = vcombine.low %v347_v35, %v348_v34 }
  0xb0   :  { %v236_v2 = vpop.permute.xlu1 %235  ;;  %3074 = vmatprep.mubr.msk.f32.mxu0 %vm550_vm3, %v454_v36  ;;  %v234_v12 = vpop.permute.xlu0 %233  ;;  %v463_v43 = vrot.slane %v455_v37, %v3715_v58 }
  0xb1   :  { %v350_v38 = vsel %vm334_vm2, %v317_v5, %v236_v2  ;;  %v349_v39 = vsel %vm334_vm2, %v316_v15, %v234_v12 }
  0xb2   :  { %v456_v42 = vcombine.low %v349_v39, %v350_v38 }
  0xb4   :  { %v470_v45 = vrot.slane %v456_v42, %v3715_v58  ;;  %v143_v46 = vpop.permute.xlu1 %142  ;;  %v141_v47 = vpop.permute.xlu0 %140 }
  0xb5   :  { %v319_v49 = vsel %vm301_vm1, %v3564_v18, %v143_v46  ;;  %v318_v50 = vsel %vm301_vm1, %v3538_v16, %v141_v47 }
  0xb6   :  { %v471_v17 = vcombine.low %v463_v43, %v470_v45 }
  0xb8   :  { %v147_v48 = vpop.permute.xlu1 %146  ;;  %3075 = vmatmul.mubr.msk.f32.gmra.mxu0 %vm550_vm3, %v471_v17  ;;  %v145_v14 = vpop.permute.xlu0 %144 }
  0xb9   :  { %v321_v55 = vsel %vm301_vm1, %v3587_v21, %v147_v48  ;;  %v320_v56 = vsel %vm301_vm1, %v3573_v19, %v145_v14 }
  0xbc   :  { %v151_v7 = vpop.permute.xlu1 %150  ;;  %v149_v40 = vpop.permute.xlu0 %148 }
  0xbd   :  { %v323_v62 = vsel %vm301_vm1, %v3601_v23, %v151_v7  ;;  %v322_v63 = vsel %vm301_vm1, %v3582_v20, %v149_v40 }
  0xc0   :  { %v155_v4 = vpop.permute.xlu1 %154  ;;  %v153_v41 = vpop.permute.xlu0 %152 }
  0xc1   :  { %v325_v8 = vsel %vm301_vm1, %v3615_v25, %v155_v4  ;;  %v324_v23 = vsel %vm301_vm1, %v3596_v22, %v153_v41 }
  0xc4   :  { %v240_v51 = vpop.permute.xlu1 %239  ;;  %v238_v52 = vpop.permute.xlu0 %237 }
  0xc5   :  { %v352_v53 = vsel %vm334_vm2, %v319_v49, %v240_v51  ;;  %v351_v54 = vsel %vm334_vm2, %v318_v50, %v238_v52 }
  0xc6   :  { %v472_v57 = vcombine.low %v351_v54, %v352_v53 }
  0xc8   :  { %v244_v59 = vpop.permute.xlu1 %243  ;;  %v242_v60 = vpop.permute.xlu0 %241  ;;  %v480_v10 = vrot.slane %v472_v57, %v3715_v58 }
  0xc9   :  { %v354_v18 = vsel %vm334_vm2, %v321_v55, %v244_v59  ;;  %v353_v61 = vsel %vm334_vm2, %v320_v56, %v242_v60 }
  0xca   :  { %v473_v16 = vcombine.low %v353_v61, %v354_v18 }
  0xcc   :  { %v487_v21 = vrot.slane %v473_v16, %v3715_v58  ;;  %v248_v1 = vpop.permute.xlu1 %247  ;;  %v246_v19 = vpop.permute.xlu0 %245 }
  0xcd   :  { %v356_v6 = vsel %vm334_vm2, %v323_v62, %v248_v1  ;;  %v355_v3 = vsel %vm334_vm2, %v322_v63, %v246_v19 }
  0xce   :  { %v488_v0 = vcombine.low %v480_v10, %v487_v21  ;;  %v489_v13 = vcombine.low %v355_v3, %v356_v6 }
  0xd0   :  { %v252_v32 = vpop.permute.xlu1 %251  ;;  %3077 = vmatprep.mubr.msk.f32.mxu0 %vm550_vm3, %v488_v0  ;;  %v250_v20 = vpop.permute.xlu0 %249  ;;  %v497_v36 = vrot.slane %v489_v13, %v3715_v58 }
  0xd1   :  { %v358_v11 = vsel %vm334_vm2, %v325_v8, %v252_v32  ;;  %v357_v34 = vsel %vm334_vm2, %v324_v23, %v250_v20 }
  0xd2   :  { %v490_v35 = vcombine.low %v357_v34, %v358_v11 }
  0xd4   :  { %v504_v5 = vrot.slane %v490_v35, %v3715_v58  ;;  %v159_v15 = vpop.permute.xlu1 %158  ;;  %v157_v37 = vpop.permute.xlu0 %156 }
  0xd5   :  { %v327_v43 = vsel %vm301_vm1, %v3636_v26, %v159_v15  ;;  %v326_v45 = vsel %vm301_vm1, %v3610_v24, %v157_v37 }
  0xd6   :  { %v505_v25 = vcombine.low %v497_v36, %v504_v5 }
  0xd8   :  { %v163_v2 = vpop.permute.xlu1 %162  ;;  %3078 = vmatmul.mubr.msk.f32.gmra.mxu0 %vm550_vm3, %v505_v25  ;;  %v161_v22 = vpop.permute.xlu0 %160 }
  0xd9   :  { %v329_v14 = vsel %vm301_vm1, %v3659_v29, %v163_v2  ;;  %v328_v7 = vsel %vm301_vm1, %v3645_v27, %v161_v22 }
  0xdc   :  { %v167_v12 = vpop.permute.xlu1 %166  ;;  %v165_v38 = vpop.permute.xlu0 %164 }
  0xdd   :  { %v331_v50 = vsel %vm301_vm1, %v3673_v31, %v167_v12  ;;  %v330_v51 = vsel %vm301_vm1, %v3654_v28, %v165_v38 }
  0xe0   :  { %v171_v39 = vpop.permute.xlu1 %170  ;;  %v169_v42 = vpop.permute.xlu0 %168 }
  0xe1   :  { %v333_v57 = vsel %vm301_vm1, %v3685_v33, %v171_v39  ;;  %v332_v31 = vsel %vm301_vm1, %v3668_v30, %v169_v42  ;;  %v2960_v30 = vld [vmem:[%s4480_s2] ss:$0 sm:$0xff]  ;;  %s3346_s2 = smov 16  }
  0xe2   :  { %v540_v33 = vcombine.low %v2960_v30, %v2960_v30 }
  0xe4   :  { %v256_v46 = vpop.permute.xlu1 %255  ;;  %v254_v47 = vpop.permute.xlu0 %253  ;;  %v547_v21 = vrot.slane %v540_v33, %v3715_v58 }
  0xe5   :  { %v360_v17 = vsel %vm334_vm2, %v327_v43, %v256_v46  ;;  %v359_v48 = vsel %vm334_vm2, %v326_v45, %v254_v47 }
  0xe6   :  { %v506_v40 = vcombine.low %v359_v48, %v360_v17  ;;  %v3831_v1 = vcombine.low %v547_v21, %v547_v21 }
  0xe8   :  { %v260_v4 = vpop.permute.xlu1 %259  ;;  %v258_v41 = vpop.permute.xlu0 %257  ;;  %v514_v52 = vrot.slane %v506_v40, %v3715_v58 }
  0xe9   :  { %v362_v26 = vsel %vm334_vm2, %v329_v14, %v260_v4  ;;  %v361_v49 = vsel %vm334_vm2, %v328_v7, %v258_v41 }
  0xea   :  { %v507_v24 = vcombine.low %v361_v49, %v362_v26 }
  0xec   :  { %v521_v29 = vrot.slane %v507_v24, %v3715_v58  ;;  %v264_v53 = vpop.permute.xlu1 %263  ;;  %v262_v27 = vpop.permute.xlu0 %261 }
  0xed   :  { %v364_v54 = vsel %vm334_vm2, %v331_v50, %v264_v53  ;;  %v363_v55 = vsel %vm334_vm2, %v330_v51, %v262_v27 }
  0xee   :  { %v522_v56 = vcombine.low %v514_v52, %v521_v29  ;;  %v523_v59 = vcombine.low %v363_v55, %v364_v54 }
  0xf0   :  { %v268_v60 = vpop.permute.xlu1 %267  ;;  %3080 = vmatprep.mubr.msk.f32.mxu0 %vm550_vm3, %v522_v56  ;;  %v266_v28 = vpop.permute.xlu0 %265  ;;  %v531_v62 = vrot.slane %v523_v59, %v3715_v58 }
  0xf1   :  { %v366_v18 = vsel %vm334_vm2, %v333_v57, %v268_v60  ;;  %v365_v61 = vsel %vm334_vm2, %v332_v31, %v266_v28 }
  0xf2   :  { %v524_v16 = vcombine.low %v365_v61, %v366_v18 }
  0xf4   :  { %v538_v63 = vrot.slane %v524_v16, %v3715_v58 }
  0xf6   :  { %v539_v10 = vcombine.low %v531_v62, %v538_v63 }
  0xf8   :  { %3081 = vmatmul.mubr.msk.f32.gmra.mxu0 %vm550_vm3, %v539_v10 }
  0xf9   :  { %3110 = vmatprep.mubr.msk.f32.mxu0 %vm3348_vm8, %v3344_v9 }
 0x158   :  { %v3073_v19 = vpop.f32.mrf.mxu0 }
 0x159   :  { %v643_v6 = vadd.f32 %v3073_v19, %v3831_v1 }
 0x15a   :  { %v637_v3 = vpop.f32.mrf.mxu0 }
 0x15b   :  { %v701_v0 = vcombine.high %v643_v6, %v643_v6  ;;  %v708_v8 = vrot.slane %v643_v6, %v3715_v58  ;;  %v638_v23 = vadd.f32 %v637_v3, %v3831_v1 }
 0x15d   :  { %v715_v13 = vrot.slane %v701_v0, %v3715_v58  ;;  %v716_v32 = vcombine.high %v708_v8, %v708_v8  ;;  %v684_v20 = vcombine.high %v638_v23, %v638_v23  ;;  %v856_v11 = vmax.f32 %v708_v8, 0.0 }
 0x15e   :  { %v691_v34 = vrot.slane %v638_v23, %v3715_v58 }
 0x15f   :  { %v717_v35 = vcombine.high %v715_v13, %v715_v13  ;;  %v857_v36 = vmax.f32 %v716_v32, 0.0  ;;  %v858_v5 = vmax.f32 %v715_v13, 0.0  ;;  %v698_v15 = vrot.slane %v684_v20, %v3715_v58 }
 0x160   :  { %v699_v37 = vcombine.high %v691_v34, %v691_v34  ;;  %v852_v25 = vmax.f32 %v691_v34, 0.0  ;;  %v891_v12 = vsel %vm884_vm4, %v856_v11, -inf }
 0x161   :  { %v859_v2 = vmax.f32 %v717_v35, 0.0  ;;  %v892_v22 = vsel %vm884_vm4, %v857_v36, -inf  ;;  %v700_v38 = vcombine.high %v698_v15, %v698_v15  ;;  %v894_v43 = vsel %vm884_vm4, %v858_v5, -inf }
 0x162   :  { %v853_v39 = vmax.f32 %v699_v37, 0.0  ;;  %v3841_v42 = vmax.f32 %v891_v12, %v892_v22  ;;  %v854_v46 = vmax.f32 %v698_v15, 0.0  ;;  %v885_v17 = vsel %vm884_vm4, %v852_v25, -inf }
 0x163   :  { %v895_v45 = vsel %vm884_vm4, %v859_v2, -inf  ;;  %v855_v47 = vmax.f32 %v700_v38, 0.0 }
 0x164   :  { %v886_v48 = vsel %vm884_vm4, %v853_v39, -inf  ;;  %v973_v14 = vrot.slane %v3841_v42, %v3715_v58  ;;  %v3849_v7 = vmax.f32 %v894_v43, %v895_v45  ;;  %v888_v41 = vsel %vm884_vm4, %v854_v46, -inf }
 0x165   :  { %v3851_v40 = vmax.f32 %v885_v17, %v886_v48  ;;  %v889_v4 = vsel %vm884_vm4, %v855_v47, -inf  ;;  %v935_v48 = vld [vmem:[%s4481_s3 + $0x10] sm:$0xff] }
 0x166   :  { %1122 = vrot.lane.b32.xlu1 %v973_v14, %s3346_s2  ;;  %1069 = vrot.lane.b32.xlu0 %v973_v14, %s3347_s20  ;;  %v980_v26 = vrot.slane %v3849_v7, %v3715_v58  ;;  %v3861_v24 = vmax.f32 %v888_v41, %v889_v4 }
 0x167   :  { %v959_v49 = vrot.slane %v3851_v40, %v3715_v58  ;;  %3083 = vmatprep.subr.mxu1 %v935_v48 }
 0x168   :  { %v966_v50 = vrot.slane %v3861_v24, %v3715_v58  ;;  %3084 = vmatpush3.msra.mxu1 %v935_v48 }
 0x16a   :  { %1071 = vrot.lane.b32.xlu1 %v980_v26, %s3347_s20  ;;  %1065 = vrot.lane.b32.xlu0 %v959_v49, %s3347_s20 }
 0x16e   :  { %1124 = vrot.lane.b32.xlu0 %v980_v26, %s3346_s2  ;;  %1067 = vrot.lane.b32.xlu1 %v966_v50, %s3347_s20 }
 0x178   :  { %v3076_v51 = vpop.f32.mrf.mxu0 }
 0x179   :  { %v653_v52 = vadd.f32 %v3076_v51, %v3831_v1 }
 0x17a   :  { %v647_v29 = vpop.f32.mrf.mxu0 }
 0x17b   :  { %v735_v53 = vcombine.high %v653_v52, %v653_v52  ;;  %v742_v27 = vrot.slane %v653_v52, %v3715_v58  ;;  %v648_v54 = vadd.f32 %v647_v29, %v3831_v1 }
 0x17d   :  { %v749_v55 = vrot.slane %v735_v53, %v3715_v58  ;;  %v750_v56 = vcombine.high %v742_v27, %v742_v27  ;;  %v718_v57 = vcombine.high %v648_v54, %v648_v54  ;;  %v864_v31 = vmax.f32 %v742_v27, 0.0 }
 0x17e   :  { %v725_v59 = vrot.slane %v648_v54, %v3715_v58  ;;  %v933_v54 = vld [vmem:[%s4481_s3] sm:$0xff] }
 0x17f   :  { %v751_v60 = vcombine.high %v749_v55, %v749_v55  ;;  %v865_v28 = vmax.f32 %v750_v56, 0.0  ;;  %v866_v18 = vmax.f32 %v749_v55, 0.0  ;;  %v732_v61 = vrot.slane %v718_v57, %v3715_v58 }
 0x180   :  { %v733_v16 = vcombine.high %v725_v59, %v725_v59  ;;  %v903_v10 = vsel %vm884_vm4, %v864_v31, -inf  ;;  %v860_v6 = vmax.f32 %v725_v59, 0.0 }
 0x181   :  { %v867_v62 = vmax.f32 %v751_v60, 0.0  ;;  %v904_v63 = vsel %vm884_vm4, %v865_v28, -inf  ;;  %v734_v30 = vcombine.high %v732_v61, %v732_v61  ;;  %v906_v3 = vsel %vm884_vm4, %v866_v18, -inf }
 0x182   :  { %v861_v33 = vmax.f32 %v733_v16, 0.0  ;;  %v3877_v21 = vmax.f32 %v903_v10, %v904_v63  ;;  %v862_v32 = vmax.f32 %v732_v61, 0.0  ;;  %v897_v20 = vsel %vm884_vm4, %v860_v6, -inf }
 0x183   :  { %v907_v19 = vsel %vm884_vm4, %v867_v62, -inf  ;;  %v863_v23 = vmax.f32 %v734_v30, 0.0 }
 0x184   :  { %v1001_v0 = vrot.slane %v3877_v21, %v3715_v58  ;;  %v3883_v8 = vmax.f32 %v906_v3, %v907_v19  ;;  %v898_v13 = vsel %vm884_vm4, %v861_v33, -inf  ;;  %v900_v36 = vsel %vm884_vm4, %v862_v32, -inf }
 0x185   :  { %v3891_v34 = vmax.f32 %v897_v20, %v898_v13  ;;  %v901_v35 = vsel %vm884_vm4, %v863_v23, -inf }
 0x186   :  { %1130 = vrot.lane.b32.xlu1 %v1001_v0, %s3346_s2  ;;  %1077 = vrot.lane.b32.xlu0 %v1001_v0, %s3347_s20  ;;  %v1008_v11 = vrot.slane %v3883_v8, %v3715_v58  ;;  %v3899_v15 = vmax.f32 %v900_v36, %v901_v35 }
 0x187   :  { %v987_v5 = vrot.slane %v3891_v34, %v3715_v58 }
 0x188   :  { %v994_v37 = vrot.slane %v3899_v15, %v3715_v58 }
 0x18a   :  { %1120 = vrot.lane.b32.xlu0 %v966_v50, %s3346_s2  ;;  %1079 = vrot.lane.b32.xlu1 %v1008_v11, %s3347_s20  ;;  %v934_v50 = vld [vmem:[%s4481_s3 + $0x8] sm:$0xff] }
 0x18b   :  { %3085 = vmatprep.subr.mxu1 %v934_v50 }
 0x18c   :  { %3086 = vmatpush3.msra.mxu1 %v934_v50 }
 0x18d   :  { %3087 = vmatprep.subr.mxu1 %v933_v54 }
 0x18e   :  { %1126 = vrot.lane.b32.xlu1 %v987_v5, %s3346_s2  ;;  %1073 = vrot.lane.b32.xlu0 %v987_v5, %s3347_s20 }
 0x18f   :  { %3088 = vmatpush3.msra.mxu1 %v933_v54 }
 0x192   :  { %1132 = vrot.lane.b32.xlu0 %v1008_v11, %s3346_s2  ;;  %1075 = vrot.lane.b32.xlu1 %v994_v37, %s3347_s20 }
 0x196   :  { %1128 = vrot.lane.b32.xlu0 %v994_v37, %s3346_s2 }
 0x198   :  { %v3079_v25 = vpop.f32.mrf.mxu0 }
 0x199   :  { %v663_v2 = vadd.f32 %v3079_v25, %v3831_v1 }
 0x19a   :  { %v657_v22 = vpop.f32.mrf.mxu0 }
 0x19b   :  { %v769_v12 = vcombine.high %v663_v2, %v663_v2  ;;  %v776_v38 = vrot.slane %v663_v2, %v3715_v58  ;;  %v658_v39 = vadd.f32 %v657_v22, %v3831_v1 }
 0x19d   :  { %v783_v43 = vrot.slane %v769_v12, %v3715_v58  ;;  %v784_v45 = vcombine.high %v776_v38, %v776_v38  ;;  %v752_v46 = vcombine.high %v658_v39, %v658_v39  ;;  %v872_v47 = vmax.f32 %v776_v38, 0.0 }
 0x19e   :  { %v759_v17 = vrot.slane %v658_v39, %v3715_v58 }
 0x19f   :  { %v785_v14 = vcombine.high %v783_v43, %v783_v43  ;;  %v873_v4 = vmax.f32 %v784_v45, 0.0  ;;  %v766_v41 = vrot.slane %v752_v46, %v3715_v58  ;;  %v915_v29 = vsel %vm884_vm4, %v872_v47, -inf }
 0x1a0   :  { %v767_v26 = vcombine.high %v759_v17, %v759_v17  ;;  %v868_v49 = vmax.f32 %v759_v17, 0.0  ;;  %v874_v56 = vmax.f32 %v783_v43, 0.0 }
 0x1a1   :  { %v916_v51 = vsel %vm884_vm4, %v873_v4, -inf  ;;  %v875_v52 = vmax.f32 %v785_v14, 0.0  ;;  %v768_v53 = vcombine.high %v766_v41, %v766_v41  ;;  %v870_v61 = vmax.f32 %v766_v41, 0.0 }
 0x1a2   :  { %v869_v27 = vmax.f32 %v767_v26, 0.0  ;;  %v3925_v55 = vmax.f32 %v915_v29, %v916_v51  ;;  %v909_v57 = vsel %vm884_vm4, %v868_v49, -inf  ;;  %v918_v16 = vsel %vm884_vm4, %v874_v56, -inf }
 0x1a3   :  { %v871_v28 = vmax.f32 %v768_v53, 0.0  ;;  %v919_v18 = vsel %vm884_vm4, %v875_v52, -inf  ;;  %v912_v30 = vsel %vm884_vm4, %v870_v61, -inf }
 0x1a4   :  { %v910_v31 = vsel %vm884_vm4, %v869_v27, -inf  ;;  %v1029_v59 = vrot.slane %v3925_v55, %v3715_v58  ;;  %v3939_v63 = vmax.f32 %v918_v16, %v919_v18 }
 0x1a5   :  { %v3931_v60 = vmax.f32 %v909_v57, %v910_v31  ;;  %v913_v10 = vsel %vm884_vm4, %v871_v28, -inf  ;;  %v1119_v31 = vrot.slane %v3344_v9, %v3715_v58 }
 0x1a6   :  { %1138 = vrot.lane.b32.xlu1 %v1029_v59, %s3346_s2  ;;  %1085 = vrot.lane.b32.xlu0 %v1029_v59, %s3347_s20  ;;  %v1036_v33 = vrot.slane %v3939_v63, %v3715_v58  ;;  %v3947_v19 = vmax.f32 %v912_v30, %v913_v10 }
 0x1a7   :  { %v1015_v62 = vrot.slane %v3931_v60, %v3715_v58 }
 0x1a8   :  { %v1022_v6 = vrot.slane %v3947_v19, %v3715_v58 }
 0x1aa   :  { %1081 = vrot.lane.b32.xlu0 %v1015_v62, %s3347_s20  ;;  %1134 = vrot.lane.b32.xlu1 %v1015_v62, %s3346_s2 }
 0x1ae   :  { %1140 = vrot.lane.b32.xlu0 %v1036_v33, %s3346_s2  ;;  %1087 = vrot.lane.b32.xlu1 %v1036_v33, %s3347_s20 }
 0x1b2   :  { %1083 = vrot.lane.b32.xlu1 %v1022_v6, %s3347_s20 }
 0x1b8   :  { %v3082_v3 = vpop.f32.mrf.mxu0 }
 0x1b9   :  { %v673_v0 = vadd.f32 %v3082_v3, %v3831_v1 }
 0x1ba   :  { %v667_v23 = vpop.f32.mrf.mxu0 }
 0x1bb   :  { %v803_v13 = vcombine.high %v673_v0, %v673_v0  ;;  %v810_v32 = vrot.slane %v673_v0, %v3715_v58  ;;  %v668_v20 = vadd.f32 %v667_v23, %v3831_v1 }
 0x1bd   :  { %v817_v11 = vrot.slane %v803_v13, %v3715_v58  ;;  %v818_v35 = vcombine.high %v810_v32, %v810_v32  ;;  %v786_v36 = vcombine.high %v668_v20, %v668_v20  ;;  %v880_v5 = vmax.f32 %v810_v32, 0.0 }
 0x1be   :  { %v793_v37 = vrot.slane %v668_v20, %v3715_v58 }
 0x1bf   :  { %v819_v25 = vcombine.high %v817_v11, %v817_v11  ;;  %v881_v2 = vmax.f32 %v818_v35, 0.0  ;;  %v882_v22 = vmax.f32 %v817_v11, 0.0  ;;  %v800_v12 = vrot.slane %v786_v36, %v3715_v58 }
 0x1c0   :  { %v801_v38 = vcombine.high %v793_v37, %v793_v37  ;;  %v927_v45 = vsel %vm884_vm4, %v880_v5, -inf  ;;  %v876_v48 = vmax.f32 %v793_v37, 0.0 }
 0x1c1   :  { %v883_v39 = vmax.f32 %v819_v25, 0.0  ;;  %v928_v43 = vsel %vm884_vm4, %v881_v2, -inf  ;;  %v802_v46 = vcombine.high %v800_v12, %v800_v12  ;;  %v930_v14 = vsel %vm884_vm4, %v882_v22, -inf }
 0x1c2   :  { %v877_v1 = vmax.f32 %v801_v38, 0.0  ;;  %v3962_v47 = vmax.f32 %v927_v45, %v928_v43  ;;  %v878_v50 = vmax.f32 %v800_v12, 0.0  ;;  %v921_v51 = vsel %vm884_vm4, %v876_v48, -inf }
 0x1c3   :  { %v931_v17 = vsel %vm884_vm4, %v883_v39, -inf  ;;  %v879_v26 = vmax.f32 %v802_v46, 0.0 }
 0x1c4   :  { %v1057_v4 = vrot.slane %v3962_v47, %v3715_v58  ;;  %v932_v41 = vmax.f32 %v930_v14, %v931_v17  ;;  %v922_v49 = vsel %vm884_vm4, %v877_v1, -inf  ;;  %v924_v27 = vsel %vm884_vm4, %v878_v50, -inf }
 0x1c5   :  { %v3973_v29 = vmax.f32 %v921_v51, %v922_v49  ;;  %v925_v53 = vsel %vm884_vm4, %v879_v26, -inf }
 0x1c6   :  { %1146 = vrot.lane.b32.xlu1 %v1057_v4, %s3346_s2  ;;  %1093 = vrot.lane.b32.xlu0 %v1057_v4, %s3347_s20  ;;  %v1064_v52 = vrot.slane %v932_v41, %v3715_v58  ;;  %v3981_v56 = vmax.f32 %v924_v27, %v925_v53 }
 0x1c7   :  { %v1043_v54 = vrot.slane %v3973_v29, %v3715_v58 }
 0x1c8   :  { %v1050_v57 = vrot.slane %v3981_v56, %v3715_v58 }
 0x1ca   :  { %1136 = vrot.lane.b32.xlu0 %v1022_v6, %s3346_s2  ;;  %1095 = vrot.lane.b32.xlu1 %v1064_v52, %s3347_s20 }
 0x1ce   :  { %1142 = vrot.lane.b32.xlu1 %v1043_v54, %s3346_s2  ;;  %1089 = vrot.lane.b32.xlu0 %v1043_v54, %s3347_s20 }
 0x1d2   :  { %1144 = vrot.lane.b32.xlu0 %v1050_v57, %s3346_s2  ;;  %1091 = vrot.lane.b32.xlu1 %v1050_v57, %s3347_s20 }
 0x1d6   :  { %1148 = vrot.lane.b32.xlu0 %v1064_v52, %s3346_s2  ;;  %1150 = vrot.lane.b32.xlu1 %v1119_v31, %s3346_s2 }
 0x1d8   :  { %v1123_v59 = vpop.permute.xlu1 %1122  ;;  %v1070_v28 = vpop.permute.xlu0 %1069 }
 0x1d9   :  { %v1171_v32 = vsel %vm1168_vm5, %v3861_v24, %v1070_v28 }
 0x1dc   :  { %v1072_v18 = vpop.permute.xlu1 %1071  ;;  %v1066_v61 = vpop.permute.xlu0 %1065 }
 0x1dd   :  { %v1169_v33 = vsel %vm1168_vm5, 0.0, %v1066_v61  ;;  %v1172_v20 = vsel %vm1168_vm5, %v3841_v42, %v1072_v18 }
 0x1e0   :  { %v1068_v16 = vpop.permute.xlu1 %1067  ;;  %v1125_v62 = vpop.permute.xlu0 %1124 }
 0x1e1   :  { %v1170_v6 = vsel %vm1168_vm5, %v3851_v40, %v1068_v16  ;;  %v1188_v36 = vsel %vm1185_vm6, %v1171_v32, %v1125_v62 }
 0x1e2   :  { %v1187_v13 = vsel %vm1185_vm6, %v1170_v6, %v1123_v59 }
 0x1f8   :  { %v1131_v10 = vpop.permute.xlu1 %1130  ;;  %v1078_v30 = vpop.permute.xlu0 %1077 }
 0x1f9   :  { %v1175_v1 = vsel %vm1168_vm5, %v3899_v15, %v1078_v30 }
 0x1fc   :  { %v1080_v3 = vpop.permute.xlu1 %1079  ;;  %v1121_v0 = vpop.permute.xlu0 %1120 }
 0x1fd   :  { %v1186_v23 = vsel %vm1185_vm6, %v1169_v33, %v1121_v0  ;;  %v1176_v17 = vsel %vm1168_vm5, %v3877_v21, %v1080_v3 }
 0x1fe   :  { %v1223_v11 = vcombine.low %v1186_v23, %v1187_v13 }
 0x200   :  { %v1127_v35 = vpop.permute.xlu1 %1126  ;;  %v1231_v37 = vrot.slane %v1223_v11, %v3715_v58  ;;  %v1074_v22 = vpop.permute.xlu0 %1073 }
 0x201   :  { %v1189_v5 = vsel %vm1185_vm6, %v1172_v20, %v1127_v35  ;;  %v1173_v42 = vsel %vm1168_vm5, %v3849_v7, %v1074_v22 }
 0x202   :  { %v1224_v40 = vcombine.low %v1188_v36, %v1189_v5 }
 0x204   :  { %v1238_v25 = vrot.slane %v1224_v40, %v3715_v58  ;;  %v1133_v24 = vpop.permute.xlu0 %1132  ;;  %v1076_v12 = vpop.permute.xlu1 %1075 }
 0x205   :  { %v1174_v39 = vsel %vm1168_vm5, %v3891_v34, %v1076_v12  ;;  %v1192_v4 = vsel %vm1185_vm6, %v1175_v1, %v1133_v24  ;;  %v1524_v24 = vld [vmem:[%s4483_s5] sm:$0xff]  ;;  %v4066_v12 = vld [vmem:[%s4484_s6 + $0x10] sm:$0xff] }
 0x206   :  { %v1239_v2 = vcombine.low %v1231_v37, %v1238_v25  ;;  %v1191_v46 = vsel %vm1185_vm6, %v1174_v39, %v1131_v10  ;;  %v2970_v39 = vld [vmem:[%s4482_s4] ss:$0 sm:$0xff] }
 0x208   :  { %3089 = vmatprep.mubr.msk.f32.mxu1 %vm1301_vm7, %v1239_v2  ;;  %v1129_v38 = vpop.permute.xlu0 %1128 }
 0x209   :  { %v1190_v45 = vsel %vm1185_vm6, %v1173_v42, %v1129_v38  ;;  %v4073_v38 = vld [vmem:[%s4484_s6 + $0x8] sm:$0xff]  ;;  %v4082_v42 = vld [vmem:[%s4484_s6] sm:$0xff] }
 0x20a   :  { %v1240_v48 = vcombine.low %v1190_v45, %v1191_v46 }
 0x20c   :  { %v1248_v34 = vrot.slane %v1240_v48, %v3715_v58 }
 0x218   :  { %v1139_v43 = vpop.permute.xlu1 %1138  ;;  %v1086_v50 = vpop.permute.xlu0 %1085 }
 0x219   :  { %v1179_v61 = vsel %vm1168_vm5, %v3947_v19, %v1086_v50 }
 0x21c   :  { %v1135_v14 = vpop.permute.xlu1 %1134  ;;  %v1082_v51 = vpop.permute.xlu0 %1081 }
 0x21d   :  { %v1193_v7 = vsel %vm1185_vm6, %v1176_v17, %v1135_v14  ;;  %v1177_v54 = vsel %vm1168_vm5, %v3883_v8, %v1082_v51 }
 0x21e   :  { %v1241_v41 = vcombine.low %v1192_v4, %v1193_v7 }
 0x220   :  { %v1255_v26 = vrot.slane %v1241_v41, %v3715_v58  ;;  %v1088_v15 = vpop.permute.xlu1 %1087  ;;  %v1141_v52 = vpop.permute.xlu0 %1140 }
 0x221   :  { %v1180_v16 = vsel %vm1168_vm5, %v3925_v55, %v1088_v15  ;;  %v1196_v8 = vsel %vm1185_vm6, %v1179_v61, %v1141_v52 }
 0x222   :  { %v1256_v49 = vcombine.low %v1248_v34, %v1255_v26 }
 0x224   :  { %3090 = vmatmul.mubr.msk.f32.vlgmr.msra.gmra.mxu1 %vm1301_vm7, %v1256_v49  ;;  %v1084_v53 = vpop.permute.xlu1 %1083 }
 0x225   :  { %v1178_v57 = vsel %vm1168_vm5, %v3931_v60, %v1084_v53 }
 0x226   :  { %v1195_v18 = vsel %vm1185_vm6, %v1178_v57, %v1139_v43  ;;  %v1291_v43 = vcombine.low %v2970_v39, %v2970_v39 }
 0x228   :  { %v1298_v45 = vrot.slane %v1291_v43, %v3715_v58 }
 0x22a   :  { %v1299_v46 = vcombine.low %v1298_v45, %v1298_v45 }
 0x238   :  { %v1147_v21 = vpop.permute.xlu1 %1146  ;;  %v1094_v27 = vpop.permute.xlu0 %1093 }
 0x239   :  { %v1183_v11 = vsel %vm1168_vm5, %v3981_v56, %v1094_v27  ;;  %v4058_v56 = vld [vmem:[%s4484_s6 + $0x18] sm:$0xff] }
 0x23a   :  { %3103 = vmatpush3.msra.mxu0 %v4058_v56 }
 0x23b   :  { %3104 = vmatprep.subr.mxu0 %v3344_v9 }
 0x23c   :  { %v1096_v31 = vpop.permute.xlu1 %1095  ;;  %v1137_v59 = vpop.permute.xlu0 %1136  ;;  %3105 = vmatpush3.msra.mxu0 %v4066_v12 }
 0x23d   :  { %v1194_v28 = vsel %vm1185_vm6, %v1177_v54, %v1137_v59  ;;  %v1184_v35 = vsel %vm1168_vm5, %v3962_v47, %v1096_v31  ;;  %v1525_v47 = vld [vmem:[%s4483_s5 + $0x8] sm:$0xff]  ;;  %3106 = vmatprep.subr.mxu0 %v3344_v9  ;;  %s2952_s5 = sshll.u32 %s3351_s16, 4  ;;  %s2953_s5 = int_to_ptr.vmem [resolvable:$true] %s2952_s5 }
 0x23e   :  { %v1257_v62 = vcombine.low %v1194_v28, %v1195_v18  ;;  %3095 = vmatprep.subr.mxu1 %v1525_v47  ;;  %3107 = vmatpush3.msra.mxu0 %v4073_v38  ;;  %s3320_s17 = scalar_lea.vmem %s2953_s5, 32  ;;  %p3325_p1 = scmp.lt.s32.totalorder %s2953_s5, %s2953_s5 }
 0x23f   :  { %3096 = vmatpush3.msra.mxu1 %v1525_v47  ;;  %3108 = vmatprep.subr.mxu0 %v3344_v9  ;;  %p3321_p0 = scmp.ne.s32.totalorder %s2953_s5, %s3320_s17  ;;  %p3326_p2 = scmp.lt.s32.totalorder %s3320_s17, %s3320_s17 }
 0x240   :  { %v1143_v10 = vpop.permute.xlu1 %1142  ;;  %v1090_v30 = vpop.permute.xlu0 %1089  ;;  %v1265_v6 = vrot.slane %v1257_v62, %v3715_v58  ;;  %3097 = vmatprep.subr.mxu1 %v1524_v24  ;;  %3109 = vmatpush3.msra.mxu0 %v4082_v42 }
 0x241   :  { %v1197_v33 = vsel %vm1185_vm6, %v1180_v16, %v1143_v10  ;;  %v1181_v0 = vsel %vm1168_vm5, %v3939_v63, %v1090_v30  ;;  %3098 = vmatpush3.msra.mxu1 %v1524_v24  ;;  %3111 = vmatmul.mubr.f32.vlgmr.msra.gmra.mxu0 %v3344_v9  ;;  %p3327_p3 = por %p3326_p2, %p3325_p1 }
 0x242   :  { %v1258_v60 = vcombine.low %v1196_v8, %v1197_v33  ;;  %3113 = vmatprep.subr.mxu1 %v3344_v9  ;;  %3124 = vmatprep.subr.mxu0 %v3344_v9 }
 0x243   :  { %3125 = vmatpush3.msra.mxu0 %v4058_v56  ;;  %3132 = vmatprep.mubr.msk.f32.mxu0 %vm3348_vm8, %v3344_v9  ;;  %p3328_p4 = pnand %p3327_p3, %p3321_p0 }
 0x244   :  { %v1272_v3 = vrot.slane %v1258_v60, %v3715_v58  ;;  %v1092_v23 = vpop.permute.xlu1 %1091  ;;  %v1145_v19 = vpop.permute.xlu0 %1144  ;;  %3126 = vmatprep.subr.mxu0 %v3344_v9 }
 0x245   :  { %v1182_v55 = vsel %vm1168_vm5, %v3973_v29, %v1092_v23  ;;  %v1198_v13 = vsel %vm1185_vm6, %v1181_v0, %v1145_v19  ;;  %3127 = vmatpush3.msra.mxu0 %v4066_v12 }
 0x246   :  { %v1273_v32 = vcombine.low %v1265_v6, %v1272_v3  ;;  %v1199_v20 = vsel %vm1185_vm6, %v1182_v55, %v1147_v21  ;;  %3128 = vmatprep.subr.mxu0 %v3344_v9 }
 0x247   :  { %v1274_v36 = vcombine.low %v1198_v13, %v1199_v20  ;;  %3129 = vmatpush3.msra.mxu0 %v4073_v38 }
 0x248   :  { %v1151_v5 = vpop.permute.xlu1 %1150  ;;  %3092 = vmatprep.mubr.msk.f32.mxu1 %vm1301_vm7, %v1273_v32  ;;  %v1149_v63 = vpop.permute.xlu0 %1148  ;;  %3130 = vmatprep.subr.mxu0 %v3344_v9 }
 0x249   :  { %v1201_v40 = vsel %vm1185_vm6, %v1184_v35, %v1151_v5  ;;  %v1200_v29 = vsel %vm1185_vm6, %v1183_v11, %v1149_v63  ;;  %v1282_v25 = vrot.slane %v1274_v36, %v3715_v58  ;;  %3131 = vmatpush3.msra.mxu0 %v4082_v42 }
 0x24a   :  { %v1275_v37 = vcombine.low %v1200_v29, %v1201_v40  ;;  %3146 = vmatprep.subr.mxu0 %v3344_v9 }
 0x24c   :  { %v1289_v2 = vrot.slane %v1275_v37, %v3715_v58 }
 0x24e   :  { %v1290_v22 = vcombine.low %v1282_v25, %v1289_v2 }
 0x250   :  { %3093 = vmatmul.mubr.msk.f32.gmra.mxu1 %vm1301_vm7, %v1290_v22 }
 0x2e4   :  { %v3091_v1 = vpop.f32.mrf.mxu1 }
 0x2e5   :  { %v1382_v17 = vadd.f32 %v3091_v1, %v1299_v46 }
 0x2e6   :  { %v1376_v48 = vpop.f32.mrf.mxu1 }
 0x2e7   :  { %v1416_v14 = vcombine.high %v1382_v17, %v1382_v17  ;;  %v1423_v4 = vrot.slane %v1382_v17, %v3715_v58  ;;  %v1377_v7 = vadd.f32 %v1376_v48, %v1299_v46 }
 0x2e9   :  { %v1430_v41 = vrot.slane %v1416_v14, %v3715_v58  ;;  %v1431_v34 = vcombine.high %v1423_v4, %v1423_v4  ;;  %v1399_v26 = vcombine.high %v1377_v7, %v1377_v7  ;;  %v1406_v49 = vrot.slane %v1377_v7, %v3715_v58 }
 0x2ea   :  { %v1487_v52 = vmax.f32 %v1423_v4, 0.0 }
 0x2eb   :  { %v1432_v50 = vcombine.high %v1430_v41, %v1430_v41  ;;  %v1488_v51 = vmax.f32 %v1431_v34, 0.0  ;;  %v1489_v15 = vmax.f32 %v1430_v41, 0.0  ;;  %v1413_v53 = vrot.slane %v1399_v26, %v3715_v58 }
 0x2ec   :  { %v1414_v21 = vcombine.high %v1406_v49, %v1406_v49  ;;  %v1483_v54 = vmax.f32 %v1406_v49, 0.0  ;;  %v1506_v16 = vsel %vm1499_vm9, %v1487_v52, -inf }
 0x2ed   :  { %v1490_v27 = vmax.f32 %v1432_v50, 0.0  ;;  %v1507_v57 = vsel %vm1499_vm9, %v1488_v51, -inf  ;;  %v1415_v31 = vcombine.high %v1413_v53, %v1413_v53  ;;  %v1485_v28 = vmax.f32 %v1413_v53, 0.0 }
 0x2ee   :  { %v1484_v59 = vmax.f32 %v1414_v21, 0.0  ;;  %v1509_v18 = vsel %vm1499_vm9, %v1489_v15, -inf  ;;  %v1508_v8 = vmax.f32 %v1506_v16, %v1507_v57  ;;  %v1500_v33 = vsel %vm1499_vm9, %v1483_v54, -inf }
 0x2ef   :  { %v1510_v61 = vsel %vm1499_vm9, %v1490_v27, -inf  ;;  %v1486_v10 = vmax.f32 %v1415_v31, 0.0  ;;  %v1503_v60 = vsel %vm1499_vm9, %v1485_v28, -inf }
 0x2f0   :  { %v1511_v62 = vmax.f32 %v1509_v18, %v1510_v61  ;;  %v1501_v30 = vsel %vm1499_vm9, %v1484_v59, -inf  ;;  %v2975_v61 = vld [vmem:[%s4485_s7] ss:$0 sm:$0xff]  ;;  %s3349_s7 = smov 64  }
 0x2f1   :  { %v1504_v6 = vsel %vm1499_vm9, %v1486_v10, -inf  ;;  %v1502_v0 = vmax.f32 %v1500_v33, %v1501_v30  ;;  %v1574_v16 = vcombine.low %v2975_v61, %v2975_v61  ;;  %v4149_v30 = vand.u32 127, %v409_v44 }
 0x2f2   :  { %v1541_v3 = vcombine.low %v1508_v8, %v1511_v62  ;;  %v1505_v23 = vmax.f32 %v1503_v60, %v1504_v6 }
 0x2f3   :  { %v1581_v62 = vrot.slane %v1574_v16, %v3715_v58  ;;  %v1713_v6 = vand.u32 31, %v4149_v30  ;;  %vm1722_vm12 = vcmp.lt.s32.totalorder %v4149_v30, 16 }
 0x2f4   :  { %v1540_v19 = vcombine.low %v1502_v0, %v1505_v23  ;;  %v1555_v13 = vrot.slane %v1541_v3, %v3715_v58 }
 0x2f5   :  { %v1582_v10 = vcombine.low %v1581_v62, %v1581_v62  ;;  %vm4161_vm10 = vcmp.lt.s32.totalorder %v1713_v6, 16 }
 0x2f6   :  { %v1548_v55 = vrot.slane %v1540_v19, %v3715_v58 }
 0x2f8   :  { %v1556_v32 = vcombine.low %v1548_v55, %v1555_v13 }
 0x2fa   :  { %3099 = vmatprep.mubr.msk.f32.mxu1 %vm1185_vm6, %v1556_v32 }
 0x301   :  { %v1799_v28 = vpop.f32.mrf.mxu0 }
 0x303   :  { %v3112_v18 = vpop.f32.mrf.mxu0 }
 0x310   :  { %v3094_v20 = vpop.f32.mrf.mxu1 }
 0x311   :  { %v1392_v11 = vadd.f32 %v3094_v20, %v1299_v46 }
 0x312   :  { %v1386_v35 = vpop.f32.mrf.mxu1 }
 0x313   :  { %v1450_v36 = vcombine.high %v1392_v11, %v1392_v11  ;;  %v1457_v5 = vrot.slane %v1392_v11, %v3715_v58  ;;  %v1387_v63 = vadd.f32 %v1386_v35, %v1299_v46 }
 0x315   :  { %v1464_v40 = vrot.slane %v1450_v36, %v3715_v58  ;;  %v1465_v29 = vcombine.high %v1457_v5, %v1457_v5  ;;  %v1433_v37 = vcombine.high %v1387_v63, %v1387_v63  ;;  %v1440_v25 = vrot.slane %v1387_v63, %v3715_v58 }
 0x316   :  { %v1495_v24 = vmax.f32 %v1457_v5, 0.0 }
 0x317   :  { %v1466_v2 = vcombine.high %v1464_v40, %v1464_v40  ;;  %v1496_v22 = vmax.f32 %v1465_v29, 0.0  ;;  %v1497_v47 = vmax.f32 %v1464_v40, 0.0  ;;  %v1447_v39 = vrot.slane %v1433_v37, %v3715_v58 }
 0x318   :  { %v1448_v43 = vcombine.high %v1440_v25, %v1440_v25  ;;  %v1491_v1 = vmax.f32 %v1440_v25, 0.0  ;;  %v1518_v41 = vsel %vm1499_vm9, %v1495_v24, -inf }
 0x319   :  { %v1498_v45 = vmax.f32 %v1466_v2, 0.0  ;;  %v1519_v17 = vsel %vm1499_vm9, %v1496_v22, -inf  ;;  %v1449_v48 = vcombine.high %v1447_v39, %v1447_v39  ;;  %v1493_v46 = vmax.f32 %v1447_v39, 0.0 }
 0x31a   :  { %v1492_v14 = vmax.f32 %v1448_v43, 0.0  ;;  %v1521_v4 = vsel %vm1499_vm9, %v1497_v47, -inf  ;;  %v1520_v50 = vmax.f32 %v1518_v41, %v1519_v17  ;;  %v1512_v51 = vsel %vm1499_vm9, %v1491_v1, -inf }
 0x31b   :  { %v1522_v7 = vsel %vm1499_vm9, %v1498_v45, -inf  ;;  %v1494_v26 = vmax.f32 %v1449_v48, 0.0  ;;  %v1515_v15 = vsel %vm1499_vm9, %v1493_v46, -inf }
 0x31c   :  { %v1523_v34 = vmax.f32 %v1521_v4, %v1522_v7  ;;  %v1513_v49 = vsel %vm1499_vm9, %v1492_v14, -inf }
 0x31d   :  { %v1516_v52 = vsel %vm1499_vm9, %v1494_v26, -inf  ;;  %v1514_v21 = vmax.f32 %v1512_v51, %v1513_v49 }
 0x31e   :  { %v1558_v53 = vcombine.low %v1520_v50, %v1523_v34  ;;  %v1517_v27 = vmax.f32 %v1515_v15, %v1516_v52 }
 0x320   :  { %v1557_v54 = vcombine.low %v1514_v21, %v1517_v27  ;;  %v1572_v57 = vrot.slane %v1558_v53, %v3715_v58 }
 0x322   :  { %v1565_v31 = vrot.slane %v1557_v54, %v3715_v58 }
 0x324   :  { %v1573_v59 = vcombine.low %v1565_v31, %v1572_v57 }
 0x326   :  { %3100 = vmatmul.mubr.msk.f32.vlgmr.msra.gmra.mxu1 %vm1185_vm6, %v1573_v59 }
 0x327   :  { %3114 = vmatpush3.msra.mxu1 %v4058_v56  ;;  %3121 = vmatprep.mubr.msk.f32.mxu1 %vm3348_vm8, %v3344_v9 }
 0x328   :  { %3115 = vmatprep.subr.mxu1 %v3344_v9 }
 0x329   :  { %3116 = vmatpush3.msra.mxu1 %v4066_v12 }
 0x32a   :  { %3117 = vmatprep.subr.mxu1 %v3344_v9 }
 0x32b   :  { %3118 = vmatpush3.msra.mxu1 %v4073_v38 }
 0x32c   :  { %3119 = vmatprep.subr.mxu1 %v3344_v9 }
 0x32d   :  { %3120 = vmatpush3.msra.mxu1 %v4082_v42 }
 0x32e   :  { %3135 = vmatprep.subr.mxu1 %v3344_v9 }
 0x3e6   :  { %v3101_v8 = vpop.f32.mrf.mxu1 }
 0x3e7   :  { %v1660_v33 = vadd.f32 %v3101_v8, %v1582_v10 }
 0x3e8   :  { %v1654_v60 = vpop.f32.mrf.mxu1 }
 0x3e9   :  { %v1682_v3 = vcombine.high %v1660_v33, %v1660_v33  ;;  %v4153_v0 = vrot.slane %v1660_v33, %v3715_v58  ;;  %v1655_v23 = vadd.f32 %v1654_v60, %v1582_v10 }
 0x3eb   :  { %v4156_v19 = vrot.slane %v1682_v3, %v3715_v58  ;;  %v1665_v55 = vcombine.high %v1655_v23, %v1655_v23  ;;  %v4159_v13 = vrot.slane %v1655_v23, %v3715_v58  ;;  %v4178_v35 = vcombine.high %v4153_v0, %v4153_v0 }
 0x3ed   :  { %v4166_v32 = vrot.slane %v1665_v55, %v3715_v58  ;;  %v4170_v20 = vcombine.high %v4156_v19, %v4156_v19  ;;  %v4174_v11 = vcombine.high %v4159_v13, %v4159_v13 }
 0x3ef   :  { %v1729_v36 = vsel %vm4161_vm10, %v4159_v13, %v4170_v20  ;;  %v1828_v5 = vsel %vm4161_vm10, %v4174_v11, %v4156_v19  ;;  %v1929_v63 = vsel %vm4161_vm10, %v4166_v32, %v4178_v35  ;;  %v4194_v40 = vcombine.high %v4166_v32, %v4166_v32 }
 0x3f0   :  { %v1803_v29 = vadd.f32 %v1799_v28, %v1729_v36  ;;  %v2232_v37 = vsel %vm4161_vm10, %v4178_v35, %v4166_v32  ;;  %v2333_v25 = vsel %vm4161_vm10, %v4156_v19, %v4174_v11  ;;  %v2434_v2 = vsel %vm4161_vm10, %v4170_v20, %v4159_v13  ;;  %v2559_v20 = vld [vmem:[%s4486_s8 + $0x18] sm:$0xff] }
 0x3f1   :  { %v2030_v22 = vsel %vm4161_vm10, %v4194_v40, %v4153_v0  ;;  %v2131_v47 = vsel %vm4161_vm10, %v4153_v0, %v4194_v40 }
 0x3f2   :  { %3222 = vtanh.f32 %v1803_v29  ;;  %v2978_v39 = vmul.f32 -1.442695, %v1803_v29 }
 0x3f4   :  { %3224 = vpow2.f32 %v2978_v39 }
 0x3ff   :  { %v3223_v24 = vpop.eup %3222 }
 0x400   :  { %1813 = vrot.lane.b32.xlu0 %v3223_v24, %s3349_s7 }
 0x401   :  { %v3225_v43 = vpop.eup %3224 }
 0x402   :  { %v1807_v45 = vadd.f32 1.0, %v3225_v43 }
 0x404   :  { %3226 = vrcp.f32 %v1807_v45 }
 0x411   :  { %v3227_v1 = vpop.eup %3226 }
 0x412   :  { %v1811_v14 = vmul.f32 0.0, %v3227_v1 }
 0x472   :  { %v1814_v17 = vpop.permute.xlu0 %1813 }
 0x473   :  { %v1816_v48 = vmul.f32 %v3227_v1, %v1814_v17 }
 0x475   :  { %1818 = vrot.lane.b32.xlu1 %v1816_v48, %s3350_s25 }
 0x4e7   :  { %v1819_v46 = vpop.permute.xlu1 %1818 }
 0x4e8   :  { %v1821_v4 = vadd.f32 %v1819_v46, %v1811_v14 }
 0x4ea   :  { %3228 = vtanh.f32 %v1821_v4 }
 0x4f7   :  { %v3229_v7 = vpop.eup %3228 }
 0x4f8   :  { %1824 = vrot.lane.b32.xlu0 %v3229_v7, %s3349_s7 }
 0x56a   :  { %v1825_v41 = vpop.permute.xlu0 %1824 }
 0x56b   :  { %v1827_v34 = vmul.f32 %v3227_v1, %v1825_v41 }
 0x56d   :  { %1830 = vrot.lane.b32.xlu1 %v1827_v34, %s3350_s25 }
 0x5df   :  { %v4220_v26 = vpop.permute.xlu1 %1830 }
 0x5e0   :  { %3122 = vmatmul.mubr.msk.f32.vlgmr.msra.gmra.mxu1 %vm1730_vm11, %v4220_v26 }
 0x5e1   :  { %3136 = vmatpush3.msra.mxu1 %v4058_v56  ;;  %3143 = vmatprep.mubr.msk.f32.mxu1 %vm3348_vm8, %v3344_v9 }
 0x5e2   :  { %3137 = vmatprep.subr.mxu1 %v3344_v9 }
 0x5e3   :  { %3138 = vmatpush3.msra.mxu1 %v4066_v12 }
 0x5e4   :  { %3139 = vmatprep.subr.mxu1 %v3344_v9 }
 0x5e5   :  { %3140 = vmatpush3.msra.mxu1 %v4073_v38 }
 0x5e6   :  { %3141 = vmatprep.subr.mxu1 %v3344_v9 }
 0x5e7   :  { %3142 = vmatpush3.msra.mxu1 %v4082_v42 }
 0x5e8   :  { %3157 = vmatprep.subr.mxu1 %v3344_v9 }
 0x6a0   :  { %v1900_v49 = vpop.f32.mrf.mxu1 }
 0x6a1   :  { %v1904_v50 = vadd.f32 %v1900_v49, %v1828_v5 }
 0x6a2   :  { %v3123_v51 = vpop.f32.mrf.mxu1 }
 0x6a3   :  { %3230 = vtanh.f32 %v1904_v50  ;;  %v2980_v52 = vmul.f32 -1.442695, %v1904_v50 }
 0x6a5   :  { %3232 = vpow2.f32 %v2980_v52 }
 0x6b0   :  { %v3231_v15 = vpop.eup %3230 }
 0x6b1   :  { %1914 = vrot.lane.b32.xlu0 %v3231_v15, %s3349_s7 }
 0x6b2   :  { %v3233_v53 = vpop.eup %3232 }
 0x6b3   :  { %v1908_v21 = vadd.f32 1.0, %v3233_v53 }
 0x6b5   :  { %3234 = vrcp.f32 %v1908_v21 }
 0x6c2   :  { %v3235_v27 = vpop.eup %3234 }
 0x6c3   :  { %v1912_v31 = vmul.f32 %v3235_v27, %v1821_v4 }
 0x723   :  { %v1915_v54 = vpop.permute.xlu0 %1914 }
 0x724   :  { %v1917_v57 = vmul.f32 %v3235_v27, %v1915_v54 }
 0x726   :  { %1919 = vrot.lane.b32.xlu1 %v1917_v57, %s3350_s25 }
 0x798   :  { %v1920_v59 = vpop.permute.xlu1 %1919 }
 0x799   :  { %v1922_v28 = vadd.f32 %v1920_v59, %v1912_v31 }
 0x79b   :  { %3236 = vtanh.f32 %v1922_v28 }
 0x7a8   :  { %v3237_v18 = vpop.eup %3236 }
 0x7a9   :  { %1925 = vrot.lane.b32.xlu0 %v3237_v18, %s3349_s7 }
 0x81b   :  { %v1926_v61 = vpop.permute.xlu0 %1925 }
 0x81c   :  { %v1928_v16 = vmul.f32 %v3235_v27, %v1926_v61 }
 0x81e   :  { %1931 = vrot.lane.b32.xlu1 %v1928_v16, %s3350_s25 }
 0x890   :  { %v4238_v62 = vpop.permute.xlu1 %1931 }
 0x891   :  { %3133 = vmatmul.mubr.msk.f32.vlgmr.msra.gmra.mxu0 %vm1730_vm11, %v4238_v62 }
 0x892   :  { %3147 = vmatpush3.msra.mxu0 %v4058_v56  ;;  %3154 = vmatprep.mubr.msk.f32.mxu0 %vm3348_vm8, %v3344_v9 }
 0x893   :  { %3148 = vmatprep.subr.mxu0 %v3344_v9 }
 0x894   :  { %3149 = vmatpush3.msra.mxu0 %v4066_v12 }
 0x895   :  { %3150 = vmatprep.subr.mxu0 %v3344_v9 }
 0x896   :  { %3151 = vmatpush3.msra.mxu0 %v4073_v38 }
 0x897   :  { %3152 = vmatprep.subr.mxu0 %v3344_v9 }
 0x898   :  { %3153 = vmatpush3.msra.mxu0 %v4082_v42 }
 0x899   :  { %3168 = vmatprep.subr.mxu0 %v3344_v9 }
 0x951   :  { %v2001_v10 = vpop.f32.mrf.mxu0 }
 0x952   :  { %v2005_v8 = vadd.f32 %v2001_v10, %v1929_v63 }
 0x953   :  { %v3134_v33 = vpop.f32.mrf.mxu0 }
 0x954   :  { %3238 = vtanh.f32 %v2005_v8  ;;  %v2982_v6 = vmul.f32 -1.442695, %v2005_v8 }
 0x956   :  { %3240 = vpow2.f32 %v2982_v6 }
 0x961   :  { %v3239_v60 = vpop.eup %3238 }
 0x962   :  { %2015 = vrot.lane.b32.xlu0 %v3239_v60, %s3349_s7 }
 0x963   :  { %v3241_v3 = vpop.eup %3240 }
 0x964   :  { %v2009_v23 = vadd.f32 1.0, %v3241_v3 }
 0x966   :  { %3242 = vrcp.f32 %v2009_v23 }
 0x973   :  { %v3243_v55 = vpop.eup %3242 }
 0x974   :  { %v2013_v29 = vmul.f32 %v3243_v55, %v1922_v28 }
 0x9d4   :  { %v2016_v36 = vpop.permute.xlu0 %2015 }
 0x9d5   :  { %v2018_v5 = vmul.f32 %v3243_v55, %v2016_v36 }
 0x9d7   :  { %2020 = vrot.lane.b32.xlu1 %v2018_v5, %s3350_s25 }
 0xa49   :  { %v2021_v24 = vpop.permute.xlu1 %2020 }
 0xa4a   :  { %v2023_v39 = vadd.f32 %v2021_v24, %v2013_v29 }
 0xa4c   :  { %3244 = vtanh.f32 %v2023_v39 }
 0xa59   :  { %v3245_v63 = vpop.eup %3244 }
 0xa5a   :  { %2026 = vrot.lane.b32.xlu0 %v3245_v63, %s3349_s7 }
 0xacc   :  { %v2027_v43 = vpop.permute.xlu0 %2026 }
 0xacd   :  { %v2029_v45 = vmul.f32 %v3243_v55, %v2027_v43 }
 0xacf   :  { %2032 = vrot.lane.b32.xlu1 %v2029_v45, %s3350_s25 }
 0xb41   :  { %v4261_v1 = vpop.permute.xlu1 %2032 }
 0xb42   :  { %3144 = vmatmul.mubr.msk.f32.vlgmr.msra.gmra.mxu1 %vm1730_vm11, %v4261_v1 }
 0xb43   :  { %3158 = vmatpush3.msra.mxu1 %v4058_v56  ;;  %3165 = vmatprep.mubr.msk.f32.mxu1 %vm3348_vm8, %v3344_v9 }
 0xb44   :  { %3159 = vmatprep.subr.mxu1 %v3344_v9 }
 0xb45   :  { %3160 = vmatpush3.msra.mxu1 %v4066_v12 }
 0xb46   :  { %3161 = vmatprep.subr.mxu1 %v3344_v9 }
 0xb47   :  { %3162 = vmatpush3.msra.mxu1 %v4073_v38 }
 0xb48   :  { %3163 = vmatprep.subr.mxu1 %v3344_v9 }
 0xb49   :  { %3164 = vmatpush3.msra.mxu1 %v4082_v42 }
 0xb4a   :  { %3179 = vmatprep.subr.mxu1 %v3344_v9 }
 0xc02   :  { %v2102_v17 = vpop.f32.mrf.mxu1 }
 0xc03   :  { %v2106_v48 = vadd.f32 %v2102_v17, %v2030_v22 }
 0xc04   :  { %v3145_v14 = vpop.f32.mrf.mxu1 }
 0xc05   :  { %3246 = vtanh.f32 %v2106_v48  ;;  %v2984_v4 = vmul.f32 -1.442695, %v2106_v48 }
 0xc07   :  { %3248 = vpow2.f32 %v2984_v4 }
 0xc12   :  { %v3247_v46 = vpop.eup %3246 }
 0xc13   :  { %2116 = vrot.lane.b32.xlu0 %v3247_v46, %s3349_s7 }
 0xc14   :  { %v3249_v7 = vpop.eup %3248 }
 0xc15   :  { %v2110_v41 = vadd.f32 1.0, %v3249_v7 }
 0xc17   :  { %3250 = vrcp.f32 %v2110_v41 }
 0xc24   :  { %v3251_v34 = vpop.eup %3250 }
 0xc25   :  { %v2114_v51 = vmul.f32 %v3251_v34, %v2023_v39 }
 0xc85   :  { %v2117_v49 = vpop.permute.xlu0 %2116 }
 0xc86   :  { %v2119_v50 = vmul.f32 %v3251_v34, %v2117_v49 }
 0xc88   :  { %2121 = vrot.lane.b32.xlu1 %v2119_v50, %s3350_s25 }
 0xcfa   :  { %v2122_v15 = vpop.permute.xlu1 %2121 }
 0xcfb   :  { %v2124_v52 = vadd.f32 %v2122_v15, %v2114_v51 }
 0xcfd   :  { %3252 = vtanh.f32 %v2124_v52 }
 0xd0a   :  { %v3253_v22 = vpop.eup %3252 }
 0xd0b   :  { %2127 = vrot.lane.b32.xlu0 %v3253_v22, %s3349_s7 }
 0xd7d   :  { %v2128_v53 = vpop.permute.xlu0 %2127 }
 0xd7e   :  { %v2130_v21 = vmul.f32 %v3251_v34, %v2128_v53 }
 0xd80   :  { %2133 = vrot.lane.b32.xlu1 %v2130_v21, %s3350_s25 }
 0xdf2   :  { %v4284_v27 = vpop.permute.xlu1 %2133 }
 0xdf3   :  { %3155 = vmatmul.mubr.msk.f32.vlgmr.msra.gmra.mxu0 %vm1730_vm11, %v4284_v27 }
 0xdf4   :  { %3169 = vmatpush3.msra.mxu0 %v4058_v56  ;;  %3176 = vmatprep.mubr.msk.f32.mxu0 %vm3348_vm8, %v3344_v9 }
 0xdf5   :  { %3170 = vmatprep.subr.mxu0 %v3344_v9 }
 0xdf6   :  { %3171 = vmatpush3.msra.mxu0 %v4066_v12 }
 0xdf7   :  { %3172 = vmatprep.subr.mxu0 %v3344_v9 }
 0xdf8   :  { %3173 = vmatpush3.msra.mxu0 %v4073_v38 }
 0xdf9   :  { %3174 = vmatprep.subr.mxu0 %v3344_v9 }
 0xdfa   :  { %3175 = vmatpush3.msra.mxu0 %v4082_v42 }
 0xdfb   :  { %3190 = vmatprep.subr.mxu0 %v2559_v20 }
 0xeb3   :  { %v2203_v54 = vpop.f32.mrf.mxu0 }
 0xeb4   :  { %v2207_v57 = vadd.f32 %v2203_v54, %v2131_v47 }
 0xeb5   :  { %v3156_v31 = vpop.f32.mrf.mxu0 }
 0xeb6   :  { %3254 = vtanh.f32 %v2207_v57  ;;  %v2986_v28 = vmul.f32 -1.442695, %v2207_v57 }
 0xeb8   :  { %3256 = vpow2.f32 %v2986_v28 }
 0xec3   :  { %v3255_v59 = vpop.eup %3254 }
 0xec4   :  { %2217 = vrot.lane.b32.xlu0 %v3255_v59, %s3349_s7 }
 0xec5   :  { %v3257_v18 = vpop.eup %3256 }
 0xec6   :  { %v2211_v61 = vadd.f32 1.0, %v3257_v18 }
 0xec8   :  { %3258 = vrcp.f32 %v2211_v61 }
 0xed5   :  { %v3259_v16 = vpop.eup %3258 }
 0xed6   :  { %v2215_v33 = vmul.f32 %v3259_v16, %v2124_v52 }
 0xf36   :  { %v2218_v10 = vpop.permute.xlu0 %2217 }
 0xf37   :  { %v2220_v8 = vmul.f32 %v3259_v16, %v2218_v10 }
 0xf39   :  { %2222 = vrot.lane.b32.xlu1 %v2220_v8, %s3350_s25 }
 0xfab   :  { %v2223_v60 = vpop.permute.xlu1 %2222 }
 0xfac   :  { %v2225_v6 = vadd.f32 %v2223_v60, %v2215_v33  ;;  %v2557_v33 = vld [vmem:[%s4486_s8 + $0x8] sm:$0xff]  ;;  %v2556_v60 = vld [vmem:[%s4486_s8] sm:$0xff] }
 0xfae   :  { %3260 = vtanh.f32 %v2225_v6 }
 0xfbb   :  { %v3261_v0 = vpop.eup %3260 }
 0xfbc   :  { %2228 = vrot.lane.b32.xlu0 %v3261_v0, %s3349_s7 }
0x102e   :  { %v2229_v40 = vpop.permute.xlu0 %2228 }
0x102f   :  { %v2231_v47 = vmul.f32 %v3259_v16, %v2229_v40 }
0x1031   :  { %2234 = vrot.lane.b32.xlu1 %v2231_v47, %s3350_s25 }
0x10a3   :  { %v4306_v3 = vpop.permute.xlu1 %2234 }
0x10a4   :  { %3166 = vmatmul.mubr.msk.f32.vlgmr.msra.gmra.mxu1 %vm1730_vm11, %v4306_v3 }
0x10a5   :  { %3180 = vmatpush3.msra.mxu1 %v4058_v56  ;;  %3187 = vmatprep.mubr.msk.f32.mxu1 %vm3348_vm8, %v3344_v9 }
0x10a6   :  { %3181 = vmatprep.subr.mxu1 %v3344_v9 }
0x10a7   :  { %3182 = vmatpush3.msra.mxu1 %v4066_v12 }
0x10a8   :  { %3183 = vmatprep.subr.mxu1 %v3344_v9 }
0x10a9   :  { %3184 = vmatpush3.msra.mxu1 %v4073_v38 }
0x10aa   :  { %3185 = vmatprep.subr.mxu1 %v3344_v9 }
0x10ab   :  { %3186 = vmatpush3.msra.mxu1 %v4082_v42 }
0x10ac   :  { %3201 = vmatprep.subr.mxu1 %v3344_v9 }
0x1164   :  { %v2304_v23 = vpop.f32.mrf.mxu1 }
0x1165   :  { %v2308_v56 = vadd.f32 %v2304_v23, %v2232_v37  ;;  %v4377_v23 = vsel %vm1722_vm12, %v4284_v27, %v4306_v3 }
0x1166   :  { %v3167_v55 = vpop.f32.mrf.mxu1 }
0x1167   :  { %3262 = vtanh.f32 %v2308_v56  ;;  %v2988_v36 = vmul.f32 -1.442695, %v2308_v56  ;;  %v4381_v56 = vsel %vm1722_vm12, %v4306_v3, %v4284_v27 }
0x1169   :  { %3264 = vpow2.f32 %v2988_v36 }
0x1174   :  { %v3263_v12 = vpop.eup %3262 }
0x1175   :  { %2318 = vrot.lane.b32.xlu0 %v3263_v12, %s3349_s7 }
0x1176   :  { %v3265_v38 = vpop.eup %3264 }
0x1177   :  { %v2312_v5 = vadd.f32 1.0, %v3265_v38 }
0x1179   :  { %3266 = vrcp.f32 %v2312_v5 }
0x1186   :  { %v3267_v42 = vpop.eup %3266 }
0x1187   :  { %v2316_v39 = vmul.f32 %v3267_v42, %v2225_v6 }
0x11e7   :  { %v2319_v29 = vpop.permute.xlu0 %2318 }
0x11e8   :  { %v2321_v24 = vmul.f32 %v3267_v42, %v2319_v29 }
0x11ea   :  { %2323 = vrot.lane.b32.xlu1 %v2321_v24, %s3350_s25 }
0x125c   :  { %v2324_v63 = vpop.permute.xlu1 %2323 }
0x125d   :  { %v2326_v43 = vadd.f32 %v2324_v63, %v2316_v39 }
0x125f   :  { %3268 = vtanh.f32 %v2326_v43 }
0x126c   :  { %v3269_v32 = vpop.eup %3268 }
0x126d   :  { %2329 = vrot.lane.b32.xlu0 %v3269_v32, %s3349_s7 }
0x12df   :  { %v2330_v35 = vpop.permute.xlu0 %2329 }
0x12e0   :  { %v2332_v37 = vmul.f32 %v3267_v42, %v2330_v35 }
0x12e2   :  { %2335 = vrot.lane.b32.xlu1 %v2332_v37, %s3350_s25 }
0x1354   :  { %v4329_v45 = vpop.permute.xlu1 %2335 }
0x1355   :  { %3177 = vmatmul.mubr.msk.f32.vlgmr.msra.gmra.mxu0 %vm1730_vm11, %v4329_v45  ;;  %v4369_v40 = vsel %vm1722_vm12, %v4261_v1, %v4329_v45  ;;  %v4373_v47 = vsel %vm1722_vm12, %v4329_v45, %v4261_v1 }
0x1356   :  { %3191 = vmatpush3.msra.mxu0 %v2559_v20  ;;  %v2569_v55 = vcombine.low %v4369_v40, %v4377_v23  ;;  %v2585_v30 = vcombine.low %v4381_v56, %v4373_v47  ;;  %v2862_v20 = vld [vmem:[%s4488_s10 + $0x10] sm:$0xff] }
0x1358   :  { %v2583_v42 = vrot.slane %v2569_v55, %v3715_v58  ;;  %v2593_v29 = vrot.slane %v2585_v30, %v3715_v58 }
0x1415   :  { %v2405_v17 = vpop.f32.mrf.mxu0 }
0x1416   :  { %v2409_v48 = vadd.f32 %v2405_v17, %v2333_v25 }
0x1417   :  { %v3178_v14 = vpop.f32.mrf.mxu0 }
0x1418   :  { %3270 = vtanh.f32 %v2409_v48  ;;  %v2990_v4 = vmul.f32 -1.442695, %v2409_v48 }
0x141a   :  { %3272 = vpow2.f32 %v2990_v4 }
0x1425   :  { %v3271_v46 = vpop.eup %3270 }
0x1426   :  { %2419 = vrot.lane.b32.xlu0 %v3271_v46, %s3349_s7 }
0x1427   :  { %v3273_v7 = vpop.eup %3272 }
0x1428   :  { %v2413_v41 = vadd.f32 1.0, %v3273_v7  ;;  %v2995_v7 = vld [vmem:[%s4487_s9] ss:$0 sm:$0xff] }
0x142a   :  { %3274 = vrcp.f32 %v2413_v41 }
0x1437   :  { %v3275_v34 = vpop.eup %3274 }
0x1438   :  { %v2417_v51 = vmul.f32 %v3275_v34, %v2326_v43 }
0x1498   :  { %v2420_v49 = vpop.permute.xlu0 %2419 }
0x1499   :  { %v2422_v50 = vmul.f32 %v3275_v34, %v2420_v49 }
0x149b   :  { %2424 = vrot.lane.b32.xlu1 %v2422_v50, %s3350_s25 }
0x150d   :  { %v2425_v15 = vpop.permute.xlu1 %2424 }
0x150e   :  { %v2427_v52 = vadd.f32 %v2425_v15, %v2417_v51 }
0x1510   :  { %3276 = vtanh.f32 %v2427_v52 }
0x151d   :  { %v3277_v19 = vpop.eup %3276 }
0x151e   :  { %2430 = vrot.lane.b32.xlu0 %v3277_v19, %s3349_s7 }
0x1590   :  { %v2431_v11 = vpop.permute.xlu0 %2430 }
0x1591   :  { %v2433_v25 = vmul.f32 %v3275_v34, %v2431_v11 }
0x1593   :  { %2436 = vrot.lane.b32.xlu1 %v2433_v25, %s3350_s25 }
0x1605   :  { %v2437_v22 = vpop.permute.xlu1 %2436 }
0x1606   :  { %3188 = vmatmul.mubr.msk.f32.vlgmr.msra.gmra.mxu1 %vm1730_vm11, %v2437_v22  ;;  %v4388_v36 = vsel %vm1722_vm12, %v4238_v62, %v2437_v22  ;;  %v4391_v1 = vsel %vm1722_vm12, %v2437_v22, %v4238_v62 }
0x1607   :  { %3209 = vmatprep.mubr.msk.f32.mxu1 %vm3348_vm8, %v3344_v9 }
0x16c6   :  { %v2506_v53 = vpop.f32.mrf.mxu1 }
0x16c7   :  { %v2510_v21 = vadd.f32 %v2506_v53, %v2434_v2  ;;  %v2558_v2 = vld [vmem:[%s4486_s8 + $0x10] sm:$0xff] }
0x16c8   :  { %v3189_v54 = vpop.f32.mrf.mxu1  ;;  %3192 = vmatprep.subr.mxu0 %v2558_v2 }
0x16c9   :  { %3278 = vtanh.f32 %v2510_v21  ;;  %v2992_v31 = vmul.f32 -1.442695, %v2510_v21  ;;  %3193 = vmatpush3.msra.mxu0 %v2558_v2  ;;  %v2861_v2 = vld [vmem:[%s4488_s10 + $0x8] sm:$0xff] }
0x16ca   :  { %3194 = vmatprep.subr.mxu0 %v2557_v33 }
0x16cb   :  { %3280 = vpow2.f32 %v2992_v31  ;;  %3195 = vmatpush3.msra.mxu0 %v2557_v33  ;;  %v2860_v33 = vld [vmem:[%s4488_s10] sm:$0xff] }
0x16cc   :  { %3196 = vmatprep.subr.mxu0 %v2556_v60 }
0x16cd   :  { %3197 = vmatpush3.msra.mxu0 %v2556_v60 }
0x16d6   :  { %v3279_v57 = vpop.eup %3278 }
0x16d7   :  { %2520 = vrot.lane.b32.xlu0 %v3279_v57, %s3349_s7 }
0x16d8   :  { %v3281_v59 = vpop.eup %3280 }
0x16d9   :  { %v2514_v28 = vadd.f32 1.0, %v3281_v59 }
0x16db   :  { %3282 = vrcp.f32 %v2514_v28 }
0x16e8   :  { %v3283_v18 = vpop.eup %3282 }
0x16e9   :  { %v2518_v44 = vmul.f32 %v3283_v18, %v2427_v52 }
0x1749   :  { %v2521_v61 = vpop.permute.xlu0 %2520 }
0x174a   :  { %v2523_v16 = vmul.f32 %v3283_v18, %v2521_v61 }
0x174c   :  { %2525 = vrot.lane.b32.xlu1 %v2523_v16, %s3350_s25 }
0x17be   :  { %v2526_v10 = vpop.permute.xlu1 %2525 }
0x17bf   :  { %v2528_v8 = vadd.f32 %v2526_v10, %v2518_v44 }
0x17c1   :  { %3284 = vtanh.f32 %v2528_v8 }
0x17ce   :  { %v3285_v13 = vpop.eup %3284 }
0x17cf   :  { %2531 = vrot.lane.b32.xlu0 %v3285_v13, %s3349_s7  ;;  %v2863_v13 = vld [vmem:[%s4488_s10 + $0x18] sm:$0xff] }
0x17d0   :  { %3202 = vmatpush3.msra.mxu1 %v2863_v13 }
0x17d1   :  { %3203 = vmatprep.subr.mxu1 %v3344_v9 }
0x17d2   :  { %3204 = vmatpush3.msra.mxu1 %v2862_v20 }
0x17d3   :  { %3205 = vmatprep.subr.mxu1 %v3344_v9 }
0x17d4   :  { %3206 = vmatpush3.msra.mxu1 %v2861_v2 }
0x17d5   :  { %3207 = vmatprep.subr.mxu1 %v3344_v9 }
0x17d6   :  { %3208 = vmatpush3.msra.mxu1 %v2860_v33 }
0x1841   :  { %v2532_v6 = vpop.permute.xlu0 %2531 }
0x1842   :  { %v2534_v0 = vmul.f32 %v3283_v18, %v2532_v6 }
0x1844   :  { %2539 = vrot.lane.b32.xlu1 %v2534_v0, %s3350_s25 }
0x18b6   :  { %v2540_v12 = vpop.permute.xlu1 %2539 }
0x18b7   :  { %v4394_v38 = vsel %vm1722_vm12, %v4220_v26, %v2540_v12  ;;  %v4397_v5 = vsel %vm1722_vm12, %v2540_v12, %v4220_v26 }
0x18b8   :  { %v2568_v27 = vcombine.low %v4394_v38, %v4388_v36  ;;  %v2586_v3 = vcombine.low %v4391_v1, %v4397_v5 }
0x18ba   :  { %v2576_v24 = vrot.slane %v2568_v27, %v3715_v58  ;;  %v2600_v62 = vrot.slane %v2586_v3, %v3715_v58 }
0x18bc   :  { %v2584_v39 = vcombine.low %v2576_v24, %v2583_v42  ;;  %v2601_v63 = vcombine.low %v2593_v29, %v2600_v62 }
0x18be   :  { %3198 = vmatprep.mubr.msk.f32.mxu0 %vm1730_vm11, %v2584_v39 }
0x18bf   :  { %3199 = vmatmul.mubr.msk.f32.vlgmr.msra.gmra.mxu0 %vm1730_vm11, %v2601_v63 }
0x197f   :  { %v3200_v26 = vpop.f32.mrf.mxu0 }
0x1980   :  { %v2700_v43 = vcombine.high %v3200_v26, %v3200_v26  ;;  %v2707_v32 = vrot.slane %v3200_v26, %v3715_v58 }
0x1981   :  { %v2672_v35 = vpop.f32.mrf.mxu0 }
0x1982   :  { %v2714_v37 = vrot.slane %v2700_v43, %v3715_v58  ;;  %v2715_v45 = vcombine.high %v2707_v32, %v2707_v32  ;;  %3286 = vtanh.f32 %v2707_v32  ;;  %v2683_v17 = vcombine.high %v2672_v35, %v2672_v35 }
0x1983   :  { %v2690_v48 = vrot.slane %v2672_v35, %v3715_v58 }
0x1984   :  { %3288 = vtanh.f32 %v2715_v45  ;;  %v2697_v46 = vrot.slane %v2683_v17, %v3715_v58  ;;  %v2716_v34 = vcombine.high %v2714_v37, %v2714_v37 }
0x1985   :  { %v2698_v14 = vcombine.high %v2690_v48, %v2690_v48  ;;  %3290 = vtanh.f32 %v2714_v37 }
0x1986   :  { %3292 = vtanh.f32 %v2690_v48  ;;  %v2699_v4 = vcombine.high %v2697_v46, %v2697_v46 }
0x1987   :  { %3294 = vtanh.f32 %v2698_v14 }
0x1988   :  { %3296 = vtanh.f32 %v2697_v46 }
0x1989   :  { %3298 = vtanh.f32 %v2699_v4 }
0x198a   :  { %3300 = vtanh.f32 %v2716_v34 }
0x198f   :  { %v3287_v41 = vpop.eup %3286 }
0x1990   :  { %v2744_v49 = vmul.f32 %v3287_v41, %v2995_v7 }
0x1991   :  { %v3289_v50 = vpop.eup %3288 }
0x1992   :  { %v2761_v51 = vsel %vm2748_vm13, %v2744_v49, 0.0  ;;  %v3291_v15 = vpop.eup %3290  ;;  %v2745_v22 = vmul.f32 %v3289_v50, %v2995_v7 }
0x1993   :  { %2762 = vadd.xlane.f32.xlu1 %v2761_v51  ;;  %v3293_v58 = vpop.eup %3292  ;;  %v2746_v54 = vmul.f32 %v3291_v15, %v2995_v7 }
0x1994   :  { %v3295_v52 = vpop.eup %3294  ;;  %v2740_v19 = vmul.f32 %v3293_v58, %v2995_v7  ;;  %v2764_v57 = vsel %vm2748_vm13, %v2745_v22, 0.0 }
0x1995   :  { %v2741_v11 = vmul.f32 %v3295_v52, %v2995_v7  ;;  %v3297_v53 = vpop.eup %3296  ;;  %v2767_v28 = vsel %vm2748_vm13, %v2746_v54, 0.0 }
0x1996   :  { %v2749_v25 = vsel %vm2748_vm13, %v2740_v19, 0.0  ;;  %v2742_v31 = vmul.f32 %v3297_v53, %v2995_v7  ;;  %v3299_v59 = vpop.eup %3298 }
0x1997   :  { %2750 = vadd.xlane.f32.xlu0 %v2749_v25  ;;  %v2752_v21 = vsel %vm2748_vm13, %v2741_v11, 0.0  ;;  %v2743_v61 = vmul.f32 %v3299_v59, %v2995_v7  ;;  %v3301_v16 = vpop.eup %3300 }
0x1998   :  { %2753 = vadd.xlane.f32.xlu1 %v2752_v21  ;;  %v2755_v18 = vsel %vm2748_vm13, %v2742_v31, 0.0  ;;  %v2747_v10 = vmul.f32 %v3301_v16, %v2995_v7 }
0x1999   :  { %v2758_v44 = vsel %vm2748_vm13, %v2743_v61, 0.0 }
0x199a   :  { %v2770_v8 = vsel %vm2748_vm13, %v2747_v10, 0.0 }
0x199b   :  { %2765 = vadd.xlane.f32.xlu0 %v2764_v57 }
0x199c   :  { %2768 = vadd.xlane.f32.xlu1 %v2767_v28 }
0x199f   :  { %2756 = vadd.xlane.f32.xlu0 %v2755_v18 }
0x19a3   :  { %2759 = vadd.xlane.f32.xlu0 %v2758_v44 }
0x19a7   :  { %2771 = vadd.xlane.f32.xlu0 %v2770_v8 }
0x1a1c   :  { %v2763_v6 = vpop.xlane.xlu1 %2762 }
0x1a1d   :  { %v2778_v9 = vsel %vm2773_vm14, %v2763_v6, -inf }
0x1a20   :  { %v2751_v60 = vpop.xlane.xlu0 %2750 }
0x1a21   :  { %v2754_v55 = vpop.xlane.xlu1 %2753  ;;  %v2774_v42 = vsel %vm2773_vm14, %v2751_v60, -inf }
0x1a22   :  { %v2775_v29 = vsel %vm2773_vm14, %v2754_v55, -inf  ;;  %v2779_v32 = vmax.f32 %v2774_v42, %v2778_v9 }
0x1a24   :  { %v2766_v0 = vpop.xlane.xlu0 %2765 }
0x1a25   :  { %v2780_v27 = vsel %vm2773_vm14, %v2766_v0, -inf  ;;  %v2769_v3 = vpop.xlane.xlu1 %2768 }
0x1a26   :  { %v2781_v62 = vmax.f32 %v2775_v29, %v2780_v27  ;;  %v2782_v63 = vsel %vm2773_vm14, %v2769_v3, -inf }
0x1a28   :  { %v2757_v30 = vpop.xlane.xlu0 %2756  ;;  %v2786_v45 = vmax.f32 %v2779_v32, %v2781_v62 }
0x1a29   :  { %v2776_v24 = vsel %vm2773_vm14, %v2757_v30, -inf }
0x1a2a   :  { %v2783_v35 = vmax.f32 %v2776_v24, %v2782_v63 }
0x1a2c   :  { %v2760_v12 = vpop.xlane.xlu0 %2759 }
0x1a2d   :  { %v2777_v26 = vsel %vm2773_vm14, %v2760_v12, -inf }
0x1a30   :  { %v2772_v39 = vpop.xlane.xlu0 %2771 }
0x1a31   :  { %v2784_v43 = vsel %vm2773_vm14, %v2772_v39, -inf }
0x1a32   :  { %v2785_v37 = vmax.f32 %v2777_v26, %v2784_v43 }
0x1a34   :  { %v2787_v17 = vmax.f32 %v2783_v35, %v2785_v37 }
0x1a36   :  { %v2788_v48 = vmax.f32 %v2786_v45, %v2787_v17 }
0x1a38   :  { %v2789_v14 = vsub.f32 %v2751_v60, %v2788_v48  ;;  %v2790_v46 = vsub.f32 %v2754_v55, %v2788_v48  ;;  %v2791_v4 = vsub.f32 %v2757_v30, %v2788_v48  ;;  %v2792_v7 = vsub.f32 %v2760_v12, %v2788_v48 }
0x1a39   :  { %v2793_v41 = vsub.f32 %v2763_v6, %v2788_v48  ;;  %v2794_v51 = vsub.f32 %v2766_v0, %v2788_v48  ;;  %v2795_v58 = vsub.f32 %v2769_v3, %v2788_v48  ;;  %v2796_v19 = vsub.f32 %v2772_v39, %v2788_v48 }
0x1a3a   :  { %v2797_v34 = vmul.f32 1.442695, %v2789_v14  ;;  %v2799_v49 = vmul.f32 1.442695, %v2790_v46  ;;  %v2801_v50 = vmul.f32 1.442695, %v2791_v4 }
0x1a3b   :  { %v2803_v15 = vmul.f32 1.442695, %v2792_v7  ;;  %v2805_v52 = vmul.f32 1.442695, %v2793_v41  ;;  %v2807_v11 = vmul.f32 1.442695, %v2794_v51 }
0x1a3c   :  { %3302 = vpow2.f32 %v2797_v34  ;;  %v2809_v25 = vmul.f32 1.442695, %v2795_v58  ;;  %v2811_v22 = vmul.f32 1.442695, %v2796_v19 }
0x1a3d   :  { %3304 = vpow2.f32 %v2799_v49 }
0x1a3e   :  { %3306 = vpow2.f32 %v2801_v50 }
0x1a3f   :  { %3308 = vpow2.f32 %v2803_v15 }
0x1a40   :  { %3310 = vpow2.f32 %v2805_v52 }
0x1a41   :  { %3312 = vpow2.f32 %v2807_v11 }
0x1a42   :  { %3314 = vpow2.f32 %v2809_v25 }
0x1a43   :  { %3316 = vpow2.f32 %v2811_v22 }
0x1a49   :  { %v3303_v53 = vpop.eup %3302 }
0x1a4a   :  { %v3305_v21 = vpop.eup %3304  ;;  %v2813_v54 = vsel %vm2773_vm14, %v3303_v53, 0.0 }
0x1a4b   :  { %v3307_v57 = vpop.eup %3306  ;;  %v2814_v31 = vsel %vm2773_vm14, %v3305_v21, 0.0 }
0x1a4c   :  { %v3309_v59 = vpop.eup %3308  ;;  %v2815_v28 = vadd.f32 %v2814_v31, %v2813_v54  ;;  %v2816_v18 = vsel %vm2773_vm14, %v3307_v57, 0.0 }
0x1a4d   :  { %v3311_v61 = vpop.eup %3310  ;;  %v2818_v44 = vsel %vm2773_vm14, %v3309_v59, 0.0 }
0x1a4e   :  { %v2817_v16 = vadd.f32 %v2816_v18, %v2815_v28  ;;  %v3313_v10 = vpop.eup %3312  ;;  %v2820_v13 = vsel %vm2773_vm14, %v3311_v61, 0.0 }
0x1a4f   :  { %v3315_v20 = vpop.eup %3314  ;;  %v2822_v33 = vsel %vm2773_vm14, %v3313_v10, 0.0 }
0x1a50   :  { %v2819_v8 = vadd.f32 %v2818_v44, %v2817_v16  ;;  %v3317_v60 = vpop.eup %3316  ;;  %v2824_v0 = vsel %vm2773_vm14, %v3315_v20, 0.0 }
0x1a51   :  { %v2826_v30 = vsel %vm2773_vm14, %v3317_v60, 0.0 }
0x1a52   :  { %v2821_v2 = vadd.f32 %v2820_v13, %v2819_v8 }
0x1a54   :  { %v2823_v6 = vadd.f32 %v2822_v33, %v2821_v2 }
0x1a56   :  { %v2825_v55 = vadd.f32 %v2824_v0, %v2823_v6 }
0x1a58   :  { %v2827_v12 = vadd.f32 %v2826_v30, %v2825_v55 }
0x1a5a   :  { %3318 = vrcp.f32 %v2827_v12 }
0x1a67   :  { %v3319_v27 = vpop.eup %3318 }
0x1a68   :  { %v2829_v3 = vmul.f32 %v3319_v27, %v3303_v53  ;;  %v2830_v42 = vmul.f32 %v3319_v27, %v3305_v21  ;;  %v2831_v29 = vmul.f32 %v3319_v27, %v3307_v57  ;;  %v2832_v24 = vmul.f32 %v3319_v27, %v3309_v59 }
0x1a69   :  { %v2833_v62 = vmul.f32 %v3319_v27, %v3311_v61  ;;  %v2834_v26 = vmul.f32 %v3319_v27, %v3313_v10  ;;  %v2835_v45 = vmul.f32 %v3319_v27, %v3315_v20  ;;  %v2836_v46 = vmul.f32 %v3319_v27, %v3317_v60 }
0x1a6a   :  { %v2837_v39 = vmul.f32 %v2829_v3, %v4394_v38  ;;  %v2838_v9 = vmul.f32 %v2830_v42, %v4388_v36  ;;  %v2839_v63 = vmul.f32 %v2831_v29, %v4369_v40  ;;  %v2840_v43 = vmul.f32 %v2832_v24, %v4377_v23 }
0x1a6b   :  { %v2841_v17 = vmul.f32 %v2833_v62, %v4381_v56  ;;  %v2842_v38 = vmul.f32 %v2834_v26, %v4373_v47  ;;  %v2843_v4 = vmul.f32 %v2835_v45, %v4391_v1  ;;  %v2844_v41 = vmul.f32 %v2836_v46, %v4397_v5  ;;  %v2996_v47 = vld [vmem:[%s4489_s11] ss:$0 sm:$0xff] }
0x1a6c   :  { %v2845_v32 = vsel %vm2748_vm13, %v2837_v39, 0.0  ;;  %v2846_v35 = vsel %vm2748_vm13, %v2838_v9, 0.0  ;;  %v2848_v48 = vsel %vm2748_vm13, %v2839_v63, 0.0  ;;  %v2850_v36 = vsel %vm2748_vm13, %v2840_v43, 0.0 }
0x1a6d   :  { %v2847_v37 = vadd.f32 %v2846_v35, %v2845_v32  ;;  %v2852_v23 = vsel %vm2748_vm13, %v2841_v17, 0.0  ;;  %v2854_v34 = vsel %vm2748_vm13, %v2842_v38, 0.0  ;;  %v2856_v56 = vsel %vm2748_vm13, %v2843_v4, 0.0 }
0x1a6e   :  { %v2858_v51 = vsel %vm2748_vm13, %v2844_v41, 0.0 }
0x1a6f   :  { %v2849_v14 = vadd.f32 %v2848_v48, %v2847_v37 }
0x1a71   :  { %v2851_v40 = vadd.f32 %v2850_v36, %v2849_v14 }
0x1a73   :  { %v2853_v7 = vadd.f32 %v2852_v23, %v2851_v40 }
0x1a75   :  { %v2855_v49 = vadd.f32 %v2854_v34, %v2853_v7 }
0x1a77   :  { %v2857_v50 = vadd.f32 %v2856_v56, %v2855_v49 }
0x1a79   :  { %v2859_v15 = vadd.f32 %v2858_v51, %v2857_v50 }
0x1a7b   :  { %3210 = vmatmul.mubr.msk.f32.vlgmr.msra.gmra.mxu1 %vm1730_vm11, %v2859_v15 }
0x1b3b   :  { %v2940_v1 = vpop.f32.mrf.mxu1 }
0x1b3c   :  { %v2941_v5 = vadd.f32 %v2996_v47, %v2940_v1 }
0x1b3d   :  { %v3211_v58 = vpop.f32.mrf.mxu1 }
0x1b3e   :  { %2945 = vst.msk [vmem:[#allocation2] sm:$0x3] %vm2944_vm15, %v2941_v5 }
0x1b3f   :  { %3331 = shalt.err (!%p3328_p4)
}
0x1b40   :  { %2955 = dma.vmem_to_hbm [thread:$0]  %s2953_s5, 32, %s4490_s12, [#allocation3]  }
0x1b41   :  { %3340 = dma.done.wait [#allocation3], 32  }
0x1b42   :  { %3341 = vsyncadd [#allocation3], 4294967264 }
0x1b43   :  { %2959 = vsyncpa [#allocation3], 1 }

</bundles_post_ra>
